<compile_context>
chip_gen: v6e
topology: v6e:2x2x1
jax: 0.10.0
libtpu: 0.0.40
codegen_flags: <defaults>
</compile_context>

<pallas_src>
import functools
import math

import jax
import jax.numpy as jnp
from jax.experimental import pallas as pl
from jax.experimental.pallas import tpu as pltpu


# ----------------------------------------------------------------------------
# In-kernel helpers (traced inside Pallas kernel bodies)
# ----------------------------------------------------------------------------
def _layernorm(x, gamma, beta, eps):
    """LayerNorm over the last axis. x: (R, H) f32; gamma/beta: (1, H)."""
    mu = jnp.mean(x, axis=-1, keepdims=True)
    var = jnp.mean((x - mu) * (x - mu), axis=-1, keepdims=True)
    return (x - mu) * jax.lax.rsqrt(var + eps) * gamma + beta


def _multi_head_attn(qkv, bias, nh, D):
    """qkv: (T, 3D) with Q already pre-scaled by 1/sqrt(dh); bias: (1, T) or None.

    Heads are unrolled statically (nh is small); returns (T, D) context.
    """
    dh = D // nh
    heads = []
    for hh in range(nh):
        q = qkv[:, hh * dh:(hh + 1) * dh]
        k = qkv[:, D + hh * dh:D + (hh + 1) * dh]
        v = qkv[:, 2 * D + hh * dh:2 * D + (hh + 1) * dh]
        s = jnp.dot(q, k.T, preferred_element_type=jnp.float32)
        if bias is not None:
            s = s + bias
        s = s - jnp.max(s, axis=-1, keepdims=True)
        p = jnp.exp(s)
        p = p * pl.reciprocal(jnp.sum(p, axis=-1, keepdims=True), approx=True)
        heads.append(jnp.dot(p, v, preferred_element_type=jnp.float32))
    return jnp.concatenate(heads, axis=-1)


# ----------------------------------------------------------------------------
# Pallas kernels
# ----------------------------------------------------------------------------
def _linear_kernel(x_ref, w_ref, b_ref, o_ref, *, activation):
    """Single-step matmul + bias (+ activation). No K-loop, no scratch."""
    y = jnp.dot(x_ref[...], w_ref[...],
                preferred_element_type=jnp.float32) + b_ref[...]
    if activation == "gelu":
        y = jax.nn.gelu(y, approximate=False)      # HF BERT "gelu" (erf)
    elif activation == "relu":
        y = jnp.maximum(y, 0.0)
    elif activation == "tanh":
        y = jnp.tanh(y)
    o_ref[...] = y.astype(o_ref.dtype)


def linear_pallas(x, w, b, activation=None):
    """out = act(x @ w + b).  x: (M, K), w: (K, N), b: (N,). Single grid step."""
    M, K = x.shape
    N = w.shape[1]
    return pl.pallas_call(
        functools.partial(_linear_kernel, activation=activation),
        out_shape=jax.ShapeDtypeStruct((M, N), x.dtype),
        grid=(1,),
        in_specs=[
            pl.BlockSpec((M, K), lambda i: (0, 0)),
            pl.BlockSpec((K, N), lambda i: (0, 0)),
            pl.BlockSpec((1, N), lambda i: (0, 0)),
        ],
        out_specs=pl.BlockSpec((M, N), lambda i: (0, 0)),
        compiler_params=pltpu.CompilerParams(dimension_semantics=("arbitrary",)),
    )(x, w, b.reshape(1, N))


def _ln_kernel(x_ref, r_ref, g_ref, b_ref, o_ref, *, eps):
    x = x_ref[...].astype(jnp.float32) + r_ref[...].astype(jnp.float32)
    o_ref[...] = _layernorm(x, g_ref[...], b_ref[...], eps).astype(o_ref.dtype)


def ln_residual_pallas(x, res, gamma, beta, eps=1e-12):
    """LayerNorm(x + res) over the last axis.  x, res: (M, H)."""
    M, H = x.shape
    return pl.pallas_call(
        functools.partial(_ln_kernel, eps=eps),
        out_shape=jax.ShapeDtypeStruct((M, H), x.dtype),
        grid=(1,),
        in_specs=[
            pl.BlockSpec((M, H), lambda i: (0, 0)),
            pl.BlockSpec((M, H), lambda i: (0, 0)),
            pl.BlockSpec((1, H), lambda i: (0, 0)),
            pl.BlockSpec((1, H), lambda i: (0, 0)),
        ],
        out_specs=pl.BlockSpec((M, H), lambda i: (0, 0)),
        compiler_params=pltpu.CompilerParams(dimension_semantics=("arbitrary",)),
    )(x, res, gamma.reshape(1, H), beta.reshape(1, H))


def _bert_layer_kernel(h_ref, bias_ref, wqkv_ref, bqkv_ref, wo_ref, bo_ref,
                       ln1g_ref, ln1b_ref, wi_ref, bi_ref, wout_ref, bout_ref,
                       ln2g_ref, ln2b_ref, o_ref, *, nh, eps):
    """Whole post-LN BERT layer for one batch element (grid axis = batch)."""
    h = h_ref[0].astype(jnp.float32)           # (S, H)
    bias = bias_ref[0].astype(jnp.float32)     # (1, S) additive mask bias
    H = h.shape[1]

    # fused Q|K|V projection (Q columns pre-scaled by 1/sqrt(dh) in wrapper)
    qkv = jnp.dot(h, wqkv_ref[...],
                  preferred_element_type=jnp.float32) + bqkv_ref[...]   # (S, 3H)
    ctx = _multi_head_attn(qkv, bias, nh, H)                            # (S, H)

    attn_out = jnp.dot(ctx, wo_ref[...],
                       preferred_element_type=jnp.float32) + bo_ref[...]
    h1 = _layernorm(attn_out + h, ln1g_ref[...], ln1b_ref[...], eps)

    inter = jax.nn.gelu(jnp.dot(h1, wi_ref[...],
                                preferred_element_type=jnp.float32) + bi_ref[...],
                        approximate=False)
    out = jnp.dot(inter, wout_ref[...],
                  preferred_element_type=jnp.float32) + bout_ref[...]
    o_ref[0] = _layernorm(out + h1, ln2g_ref[...], ln2b_ref[...], eps
                          ).astype(o_ref.dtype)


def bert_layer_fused(lp, h, bias, nh, eps=1e-12):
    """h: (B, S, H); bias: (B, 1, S) additive.  Returns (B, S, H)."""
    B, S, H = h.shape
    I = lp["i_w"].shape[1]
    dh = H // nh
    scale = 1.0 / math.sqrt(dh)
    wqkv = jnp.concatenate([lp["q_w"] * scale, lp["k_w"], lp["v_w"]], axis=1)
    bqkv = jnp.concatenate([lp["q_b"] * scale, lp["k_b"], lp["v_b"]], axis=0)

    return pl.pallas_call(
        functools.partial(_bert_layer_kernel, nh=nh, eps=eps),
        out_shape=jax.ShapeDtypeStruct((B, S, H), h.dtype),
        grid=(B,),
        in_specs=[
            pl.BlockSpec((1, S, H), lambda b: (b, 0, 0)),
            pl.BlockSpec((1, 1, S), lambda b: (b, 0, 0)),
            pl.BlockSpec((H, 3 * H), lambda b: (0, 0)),
            pl.BlockSpec((1, 3 * H), lambda b: (0, 0)),
            pl.BlockSpec((H, H), lambda b: (0, 0)),
            pl.BlockSpec((1, H), lambda b: (0, 0)),
            pl.BlockSpec((1, H), lambda b: (0, 0)),
            pl.BlockSpec((1, H), lambda b: (0, 0)),
            pl.BlockSpec((H, I), lambda b: (0, 0)),
            pl.BlockSpec((1, I), lambda b: (0, 0)),
            pl.BlockSpec((I, H), lambda b: (0, 0)),
            pl.BlockSpec((1, H), lambda b: (0, 0)),
            pl.BlockSpec((1, H), lambda b: (0, 0)),
            pl.BlockSpec((1, H), lambda b: (0, 0)),
        ],
        out_specs=pl.BlockSpec((1, S, H), lambda b: (b, 0, 0)),
        compiler_params=pltpu.CompilerParams(dimension_semantics=("parallel",)),
    )(h, bias, wqkv, bqkv.reshape(1, 3 * H),
      lp["ao_w"], lp["ao_b"].reshape(1, H),
      lp["ln1_g"].reshape(1, H), lp["ln1_b"].reshape(1, H),
      lp["i_w"], lp["i_b"].reshape(1, I),
      lp["o_w"], lp["o_b"].reshape(1, H),
      lp["ln2_g"].reshape(1, H), lp["ln2_b"].reshape(1, H))


def _interaction_kernel(x_ref, wqkv_ref, bqkv_ref, wo_ref, bo_ref,
                        g_ref, b_ref, o_ref, *, nh, eps):
    """BertAttention block (QKV + MHA + out-proj + residual LN) for one
    group of T=4 CP-token-field embeddings (grid axis = token group)."""
    x = x_ref[0].astype(jnp.float32)           # (T, D)
    D = x.shape[1]
    qkv = jnp.dot(x, wqkv_ref[...],
                  preferred_element_type=jnp.float32) + bqkv_ref[...]   # (T, 3D)
    ctx = _multi_head_attn(qkv, None, nh, D)                            # (T, D)
    attn_out = jnp.dot(ctx, wo_ref[...],
                       preferred_element_type=jnp.float32) + bo_ref[...]
    o_ref[0] = _layernorm(attn_out + x, g_ref[...], b_ref[...], eps
                          ).astype(o_ref.dtype)


def interaction_attention_fused(ip, x, nh=4, eps=1e-12):
    """x: (N, T, D) token-field embeddings (N = batch*seq, T = 4 fields)."""
    N, T, D = x.shape
    dh = D // nh
    scale = 1.0 / math.sqrt(dh)
    wqkv = jnp.concatenate([ip["q_w"] * scale, ip["k_w"], ip["v_w"]], axis=1)
    bqkv = jnp.concatenate([ip["q_b"] * scale, ip["k_b"], ip["v_b"]], axis=0)

    return pl.pallas_call(
        functools.partial(_interaction_kernel, nh=nh, eps=eps),
        out_shape=jax.ShapeDtypeStruct((N, T, D), x.dtype),
        grid=(N,),
        in_specs=[
            pl.BlockSpec((1, T, D), lambda i: (i, 0, 0)),
            pl.BlockSpec((D, 3 * D), lambda i: (0, 0)),
            pl.BlockSpec((1, 3 * D), lambda i: (0, 0)),
            pl.BlockSpec((D, D), lambda i: (0, 0)),
            pl.BlockSpec((1, D), lambda i: (0, 0)),
            pl.BlockSpec((1, D), lambda i: (0, 0)),
            pl.BlockSpec((1, D), lambda i: (0, 0)),
        ],
        out_specs=pl.BlockSpec((1, T, D), lambda i: (i, 0, 0)),
        compiler_params=pltpu.CompilerParams(dimension_semantics=("parallel",)),
    )(x, wqkv, bqkv.reshape(1, 3 * D),
      ip["o_w"], ip["o_b"].reshape(1, D),
      ip["ln_g"].reshape(1, D), ip["ln_b"].reshape(1, D))


# ----------------------------------------------------------------------------
# MidiFormer forward
# ----------------------------------------------------------------------------
def midiformer_forward(p, input_ids, attn_mask, mode="mlm", use_fif=True):
    B, slen, _ = input_ids.shape
    H, nh, emb_size = p["H"], p["NH"], p["EMB"]

    # special token embedding from the former's word-embedding table
    special_id = 0 if mode == "mlm" else 1
    special_ids = jnp.full((B, 1), special_id, dtype=jnp.int32)
    special_emb = jnp.take(p["former_word_emb"], special_ids, axis=0)     # (B, 1, H)

    # CP word embeddings (Embeddings: lut(x) * sqrt(d_model))
    emb_list = [jnp.take(p["word_emb"][i], input_ids[..., i], axis=0)
                * math.sqrt(float(emb_size)) for i in range(4)]

    if not use_fif:
        embs = jnp.concatenate(emb_list, axis=-1)                         # (B, slen, 1024)
    else:
        stacked = jnp.stack(emb_list, axis=2)                             # (B, slen, 4, 256)
        flat = stacked.reshape(B * slen, 4, emb_size)
        embs = interaction_attention_fused(p["inter"], flat
                                           ).reshape(B, slen, 4 * emb_size)

    # in_linear: 4*256 -> hidden (single-step kernel; K=1024 fits in VMEM)
    emb_lin = linear_pallas(embs.reshape(B * slen, 4 * emb_size),
                            p["in_w"], p["in_b"]).reshape(B, slen, H)
    emb_lin = jnp.concatenate([special_emb, emb_lin], axis=1)             # (B, S, H)
    mask = jnp.concatenate([jnp.ones((B, 1), jnp.float32),
                            attn_mask.astype(jnp.float32)], axis=1)       # (B, S)

    # ---- former (BERT): embeddings -> encoder -> pooler ----
    S = slen + 1
    pos_type = p["pos_emb"][:S] + p["type_emb"][0]                        # (S, H)
    res = jnp.broadcast_to(pos_type, (B, S, H)).reshape(B * S, H)
    h = ln_residual_pallas(emb_lin.reshape(B * S, H), res,
                           p["emb_ln_g"], p["emb_ln_b"]).reshape(B, S, H)
    hidden_states = [h]

    bias = ((1.0 - mask) * -10000.0)[:, None, :]                          # (B, 1, S)

    for lp in p["layers"]:
        h = bert_layer_fused(lp, h, bias, nh)
        hidden_states.append(h)

    last = hidden_states[-1]
    pooled = linear_pallas(last[:, 0, :], p["pool_w"], p["pool_b"],
                           activation="tanh")
    return {"last_hidden_state": last,
            "pooler_output": pooled,
            "hidden_states": tuple(hidden_states)}


# ----------------------------------------------------------------------------
# Deterministic synthetic parameters
# ----------------------------------------------------------------------------
def init_midiformer_params(key):
    H, NH, LAYERS, INTER = 64, 4, 2, 128      # small former config
    MAXPOS, VOCAB_F, NTYPE = 32, 4, 2
    EMB = 256                                 # emb_sizes = [256]*4 (fixed by module)
    n_tokens = [16, 18, 20, 22]

    keys = iter(jax.random.split(key, 128))
    nrm = lambda shape, s=0.02: s * jax.random.normal(next(keys), shape, jnp.float32)
    zeros = lambda n: jnp.zeros((n,), jnp.float32)
    ones = lambda n: jnp.ones((n,), jnp.float32)

    def layer_params():
        return {
            "q_w": nrm((H, H)), "q_b": zeros(H),
            "k_w": nrm((H, H)), "k_b": zeros(H),
            "v_w": nrm((H, H)), "v_b": zeros(H),
            "ao_w": nrm((H, H)), "ao_b": zeros(H),
            "ln1_g": ones(H), "ln1_b": zeros(H),
            "i_w": nrm((H, INTER)), "i_b": zeros(INTER),
            "o_w": nrm((INTER, H)), "o_b": zeros(H),
            "ln2_g": ones(H), "ln2_b": zeros(H),
        }

    params = {
        "H": H, "NH": NH, "EMB": EMB, "n_tokens": n_tokens,
        "word_emb": [nrm((n_tokens[i], EMB)) for i in range(4)],
        "in_w": nrm((4 * EMB, H)), "in_b": zeros(H),
        "former_word_emb": nrm((VOCAB_F, H)),
        "pos_emb": nrm((MAXPOS, H)),
        "type_emb": nrm((NTYPE, H)),
        "emb_ln_g": ones(H), "emb_ln_b": zeros(H),
        "pool_w": nrm((H, H)), "pool_b": zeros(H),
        "inter": {
            "q_w": nrm((EMB, EMB)), "q_b": zeros(EMB),
            "k_w": nrm((EMB, EMB)), "k_b": zeros(EMB),
            "v_w": nrm((EMB, EMB)), "v_b": zeros(EMB),
            "o_w": nrm((EMB, EMB)), "o_b": zeros(EMB),
            "ln_g": ones(EMB), "ln_b": zeros(EMB),
        },
        "layers": [layer_params() for _ in range(LAYERS)],
    }
    return params


if __name__ == "__main__":
    key = jax.random.PRNGKey(0)
    kp, ki = jax.random.split(key)
    params = init_midiformer_params(kp)

    B, slen = 2, 8
    id_keys = jax.random.split(ki, 4)
    cols = [jax.random.randint(id_keys[i], (B, slen), 0, params["n_tokens"][i],
                               dtype=jnp.int32) for i in range(4)]
    input_ids = jnp.stack(cols, axis=-1)            # (2, 8, 4)
    attn_mask = jnp.ones((B, slen), jnp.float32)    # (2, 8)

    # use_fif=True path (token-field interaction attention) ...
    out_fif = midiformer_forward(params, input_ids, attn_mask, mode="mlm", use_fif=True)
    # ... and use_fif=False path (plain concat of field embeddings)
    out_cat = midiformer_forward(params, input_ids, attn_mask, mode="mlm", use_fif=False)

    jax.block_until_ready(out_fif["last_hidden_state"])
    jax.block_until_ready(out_fif["pooler_output"])
    jax.block_until_ready(out_cat["last_hidden_state"])

    assert out_fif["last_hidden_state"].shape == (B, slen + 1, params["H"])
    assert out_fif["pooler_output"].shape == (B, params["H"])
    assert len(out_fif["hidden_states"]) == len(params["layers"]) + 1
    print("KERNEL_OK")
</pallas_src>

<mosaic_0001>
module attributes {stable_mosaic.version = 11 : i64} {
  func.func @_interaction_kernel(%arg0: i32, %arg1: memref<1x4x256xf32, #tpu.memory_space<vmem>>, %arg2: memref<256x768xf32, #tpu.memory_space<vmem>>, %arg3: memref<1x768xf32, #tpu.memory_space<vmem>>, %arg4: memref<256x256xf32, #tpu.memory_space<vmem>>, %arg5: memref<1x256xf32, #tpu.memory_space<vmem>>, %arg6: memref<1x256xf32, #tpu.memory_space<vmem>>, %arg7: memref<1x256xf32, #tpu.memory_space<vmem>>, %arg8: memref<1x4x256xf32, #tpu.memory_space<vmem>>) attributes {dimension_semantics = [#tpu.dimension_semantics<parallel>], iteration_bounds = array<i64: 16>, scalar_prefetch = 0 : i64, scratch_operands = 0 : i64, tpu.core_type = #tpu.core_type<tc>, window_params = [{transform_indices = @transform_0, window_bounds = array<i64: 1, 4, 256>}, {pipeline_mode = #tpu.pipeline_mode<synchronous>, transform_indices = @transform_1, window_bounds = array<i64: 256, 768>}, {pipeline_mode = #tpu.pipeline_mode<synchronous>, transform_indices = @transform_2, window_bounds = array<i64: 1, 768>}, {pipeline_mode = #tpu.pipeline_mode<synchronous>, transform_indices = @transform_3, window_bounds = array<i64: 256, 256>}, {pipeline_mode = #tpu.pipeline_mode<synchronous>, transform_indices = @transform_4, window_bounds = array<i64: 1, 256>}, {pipeline_mode = #tpu.pipeline_mode<synchronous>, transform_indices = @transform_5, window_bounds = array<i64: 1, 256>}, {pipeline_mode = #tpu.pipeline_mode<synchronous>, transform_indices = @transform_6, window_bounds = array<i64: 1, 256>}, {transform_indices = @transform_7, window_bounds = array<i64: 1, 4, 256>}]} {
    %c0 = arith.constant 0 : index
    %c0_0 = arith.constant 0 : index
    %c0_1 = arith.constant 0 : index
    %0 = vector.load %arg1[%c0, %c0_0, %c0_1] : memref<1x4x256xf32, #tpu.memory_space<vmem>>, vector<1x4x256xf32>
    %1 = vector.shape_cast %0 : vector<1x4x256xf32> to vector<4x256xf32>
    %c0_2 = arith.constant 0 : index
    %c0_3 = arith.constant 0 : index
    %2 = vector.load %arg2[%c0_2, %c0_3] : memref<256x768xf32, #tpu.memory_space<vmem>>, vector<256x768xf32>
    %cst = arith.constant dense<0.000000e+00> : vector<4x768xf32>
    %3 = tpu.matmul %1, %2, %cst {dimension_numbers = #tpu.dot_dimension_numbers<[1], [0], [0], [1], [0, 0, 1, 1], [], []>} : vector<4x256xf32>, vector<256x768xf32>, vector<4x768xf32> -> vector<4x768xf32>
    %c0_4 = arith.constant 0 : index
    %c0_5 = arith.constant 0 : index
    %4 = vector.load %arg3[%c0_4, %c0_5] : memref<1x768xf32, #tpu.memory_space<vmem>>, vector<1x768xf32>
    %5 = vector.broadcast %4 : vector<1x768xf32> to vector<4x768xf32>
    %6 = arith.addf %3, %5 : vector<4x768xf32>
    %7 = vector.extract_strided_slice %6 {offsets = [0, 0], sizes = [4, 64], strides = [1, 1]} : vector<4x768xf32> to vector<4x64xf32>
    %8 = vector.extract_strided_slice %6 {offsets = [0, 256], sizes = [4, 64], strides = [1, 1]} : vector<4x768xf32> to vector<4x64xf32>
    %9 = vector.extract_strided_slice %6 {offsets = [0, 512], sizes = [4, 64], strides = [1, 1]} : vector<4x768xf32> to vector<4x64xf32>
    %10 = tpu.transpose %8, [1, 0] : vector<4x64xf32> -> vector<64x4xf32>
    %cst_6 = arith.constant dense<0.000000e+00> : vector<4x4xf32>
    %11 = tpu.matmul %7, %10, %cst_6 {dimension_numbers = #tpu.dot_dimension_numbers<[1], [0], [0], [1], [0, 0, 1, 1], [], []>} : vector<4x64xf32>, vector<64x4xf32>, vector<4x4xf32> -> vector<4x4xf32>
    %cst_7 = arith.constant dense<0xFF800000> : vector<4xf32>
    %12 = vector.multi_reduction <maximumf>, %11, %cst_7 [1] : vector<4x4xf32> to vector<4xf32>
    %13 = vector.shape_cast %12 : vector<4xf32> to vector<4x1xf32>
    %14 = vector.broadcast %13 : vector<4x1xf32> to vector<4x4xf32>
    %15 = arith.subf %11, %14 : vector<4x4xf32>
    %16 = math.exp %15 : vector<4x4xf32>
    %cst_8 = arith.constant dense<0.000000e+00> : vector<4xf32>
    %17 = vector.multi_reduction <add>, %16, %cst_8 [1] : vector<4x4xf32> to vector<4xf32>
    %18 = vector.shape_cast %17 : vector<4xf32> to vector<4x1xf32>
    %19 = tpu.reciprocal %18 {approx = true} : vector<4x1xf32> -> vector<4x1xf32>
    %20 = vector.broadcast %19 : vector<4x1xf32> to vector<4x4xf32>
    %21 = arith.mulf %16, %20 : vector<4x4xf32>
    %cst_9 = arith.constant dense<0.000000e+00> : vector<4x64xf32>
    %22 = tpu.matmul %21, %9, %cst_9 {dimension_numbers = #tpu.dot_dimension_numbers<[1], [0], [0], [1], [0, 0, 1, 1], [], []>} : vector<4x4xf32>, vector<4x64xf32>, vector<4x64xf32> -> vector<4x64xf32>
    %23 = vector.extract_strided_slice %6 {offsets = [0, 64], sizes = [4, 64], strides = [1, 1]} : vector<4x768xf32> to vector<4x64xf32>
    %24 = vector.extract_strided_slice %6 {offsets = [0, 320], sizes = [4, 64], strides = [1, 1]} : vector<4x768xf32> to vector<4x64xf32>
    %25 = vector.extract_strided_slice %6 {offsets = [0, 576], sizes = [4, 64], strides = [1, 1]} : vector<4x768xf32> to vector<4x64xf32>
    %26 = tpu.transpose %24, [1, 0] : vector<4x64xf32> -> vector<64x4xf32>
    %cst_10 = arith.constant dense<0.000000e+00> : vector<4x4xf32>
    %27 = tpu.matmul %23, %26, %cst_10 {dimension_numbers = #tpu.dot_dimension_numbers<[1], [0], [0], [1], [0, 0, 1, 1], [], []>} : vector<4x64xf32>, vector<64x4xf32>, vector<4x4xf32> -> vector<4x4xf32>
    %cst_11 = arith.constant dense<0xFF800000> : vector<4xf32>
    %28 = vector.multi_reduction <maximumf>, %27, %cst_11 [1] : vector<4x4xf32> to vector<4xf32>
    %29 = vector.shape_cast %28 : vector<4xf32> to vector<4x1xf32>
    %30 = vector.broadcast %29 : vector<4x1xf32> to vector<4x4xf32>
    %31 = arith.subf %27, %30 : vector<4x4xf32>
    %32 = math.exp %31 : vector<4x4xf32>
    %cst_12 = arith.constant dense<0.000000e+00> : vector<4xf32>
    %33 = vector.multi_reduction <add>, %32, %cst_12 [1] : vector<4x4xf32> to vector<4xf32>
    %34 = vector.shape_cast %33 : vector<4xf32> to vector<4x1xf32>
    %35 = tpu.reciprocal %34 {approx = true} : vector<4x1xf32> -> vector<4x1xf32>
    %36 = vector.broadcast %35 : vector<4x1xf32> to vector<4x4xf32>
    %37 = arith.mulf %32, %36 : vector<4x4xf32>
    %cst_13 = arith.constant dense<0.000000e+00> : vector<4x64xf32>
    %38 = tpu.matmul %37, %25, %cst_13 {dimension_numbers = #tpu.dot_dimension_numbers<[1], [0], [0], [1], [0, 0, 1, 1], [], []>} : vector<4x4xf32>, vector<4x64xf32>, vector<4x64xf32> -> vector<4x64xf32>
    %39 = vector.extract_strided_slice %6 {offsets = [0, 128], sizes = [4, 64], strides = [1, 1]} : vector<4x768xf32> to vector<4x64xf32>
    %40 = vector.extract_strided_slice %6 {offsets = [0, 384], sizes = [4, 64], strides = [1, 1]} : vector<4x768xf32> to vector<4x64xf32>
    %41 = vector.extract_strided_slice %6 {offsets = [0, 640], sizes = [4, 64], strides = [1, 1]} : vector<4x768xf32> to vector<4x64xf32>
    %42 = tpu.transpose %40, [1, 0] : vector<4x64xf32> -> vector<64x4xf32>
    %cst_14 = arith.constant dense<0.000000e+00> : vector<4x4xf32>
    %43 = tpu.matmul %39, %42, %cst_14 {dimension_numbers = #tpu.dot_dimension_numbers<[1], [0], [0], [1], [0, 0, 1, 1], [], []>} : vector<4x64xf32>, vector<64x4xf32>, vector<4x4xf32> -> vector<4x4xf32>
    %cst_15 = arith.constant dense<0xFF800000> : vector<4xf32>
    %44 = vector.multi_reduction <maximumf>, %43, %cst_15 [1] : vector<4x4xf32> to vector<4xf32>
    %45 = vector.shape_cast %44 : vector<4xf32> to vector<4x1xf32>
    %46 = vector.broadcast %45 : vector<4x1xf32> to vector<4x4xf32>
    %47 = arith.subf %43, %46 : vector<4x4xf32>
    %48 = math.exp %47 : vector<4x4xf32>
    %cst_16 = arith.constant dense<0.000000e+00> : vector<4xf32>
    %49 = vector.multi_reduction <add>, %48, %cst_16 [1] : vector<4x4xf32> to vector<4xf32>
    %50 = vector.shape_cast %49 : vector<4xf32> to vector<4x1xf32>
    %51 = tpu.reciprocal %50 {approx = true} : vector<4x1xf32> -> vector<4x1xf32>
    %52 = vector.broadcast %51 : vector<4x1xf32> to vector<4x4xf32>
    %53 = arith.mulf %48, %52 : vector<4x4xf32>
    %cst_17 = arith.constant dense<0.000000e+00> : vector<4x64xf32>
    %54 = tpu.matmul %53, %41, %cst_17 {dimension_numbers = #tpu.dot_dimension_numbers<[1], [0], [0], [1], [0, 0, 1, 1], [], []>} : vector<4x4xf32>, vector<4x64xf32>, vector<4x64xf32> -> vector<4x64xf32>
    %55 = vector.extract_strided_slice %6 {offsets = [0, 192], sizes = [4, 64], strides = [1, 1]} : vector<4x768xf32> to vector<4x64xf32>
    %56 = vector.extract_strided_slice %6 {offsets = [0, 448], sizes = [4, 64], strides = [1, 1]} : vector<4x768xf32> to vector<4x64xf32>
    %57 = vector.extract_strided_slice %6 {offsets = [0, 704], sizes = [4, 64], strides = [1, 1]} : vector<4x768xf32> to vector<4x64xf32>
    %58 = tpu.transpose %56, [1, 0] : vector<4x64xf32> -> vector<64x4xf32>
    %cst_18 = arith.constant dense<0.000000e+00> : vector<4x4xf32>
    %59 = tpu.matmul %55, %58, %cst_18 {dimension_numbers = #tpu.dot_dimension_numbers<[1], [0], [0], [1], [0, 0, 1, 1], [], []>} : vector<4x64xf32>, vector<64x4xf32>, vector<4x4xf32> -> vector<4x4xf32>
    %cst_19 = arith.constant dense<0xFF800000> : vector<4xf32>
    %60 = vector.multi_reduction <maximumf>, %59, %cst_19 [1] : vector<4x4xf32> to vector<4xf32>
    %61 = vector.shape_cast %60 : vector<4xf32> to vector<4x1xf32>
    %62 = vector.broadcast %61 : vector<4x1xf32> to vector<4x4xf32>
    %63 = arith.subf %59, %62 : vector<4x4xf32>
    %64 = math.exp %63 : vector<4x4xf32>
    %cst_20 = arith.constant dense<0.000000e+00> : vector<4xf32>
    %65 = vector.multi_reduction <add>, %64, %cst_20 [1] : vector<4x4xf32> to vector<4xf32>
    %66 = vector.shape_cast %65 : vector<4xf32> to vector<4x1xf32>
    %67 = tpu.reciprocal %66 {approx = true} : vector<4x1xf32> -> vector<4x1xf32>
    %68 = vector.broadcast %67 : vector<4x1xf32> to vector<4x4xf32>
    %69 = arith.mulf %64, %68 : vector<4x4xf32>
    %cst_21 = arith.constant dense<0.000000e+00> : vector<4x64xf32>
    %70 = tpu.matmul %69, %57, %cst_21 {dimension_numbers = #tpu.dot_dimension_numbers<[1], [0], [0], [1], [0, 0, 1, 1], [], []>} : vector<4x4xf32>, vector<4x64xf32>, vector<4x64xf32> -> vector<4x64xf32>
    %71 = tpu.concatenate %22, %38, %54, %70 in 1 : vector<4x64xf32>, vector<4x64xf32>, vector<4x64xf32>, vector<4x64xf32> -> vector<4x256xf32>
    %c0_22 = arith.constant 0 : index
    %c0_23 = arith.constant 0 : index
    %72 = vector.load %arg4[%c0_22, %c0_23] : memref<256x256xf32, #tpu.memory_space<vmem>>, vector<256x256xf32>
    %cst_24 = arith.constant dense<0.000000e+00> : vector<4x256xf32>
    %73 = tpu.matmul %71, %72, %cst_24 {dimension_numbers = #tpu.dot_dimension_numbers<[1], [0], [0], [1], [0, 0, 1, 1], [], []>} : vector<4x256xf32>, vector<256x256xf32>, vector<4x256xf32> -> vector<4x256xf32>
    %c0_25 = arith.constant 0 : index
    %c0_26 = arith.constant 0 : index
    %74 = vector.load %arg5[%c0_25, %c0_26] : memref<1x256xf32, #tpu.memory_space<vmem>>, vector<1x256xf32>
    %75 = vector.broadcast %74 : vector<1x256xf32> to vector<4x256xf32>
    %76 = arith.addf %73, %75 : vector<4x256xf32>
    %77 = arith.addf %76, %1 : vector<4x256xf32>
    %c0_27 = arith.constant 0 : index
    %c0_28 = arith.constant 0 : index
    %78 = vector.load %arg6[%c0_27, %c0_28] : memref<1x256xf32, #tpu.memory_space<vmem>>, vector<1x256xf32>
    %c0_29 = arith.constant 0 : index
    %c0_30 = arith.constant 0 : index
    %79 = vector.load %arg7[%c0_29, %c0_30] : memref<1x256xf32, #tpu.memory_space<vmem>>, vector<1x256xf32>
    %cst_31 = arith.constant dense<0.000000e+00> : vector<4xf32>
    %80 = vector.multi_reduction <add>, %77, %cst_31 [1] : vector<4x256xf32> to vector<4xf32>
    %81 = vector.shape_cast %80 : vector<4xf32> to vector<4x1xf32>
    %cst_32 = arith.constant 2.560000e+02 : f32
    %82 = vector.broadcast %cst_32 : f32 to vector<4x1xf32>
    %83 = arith.divf %81, %82 : vector<4x1xf32>
    %84 = vector.broadcast %83 : vector<4x1xf32> to vector<4x256xf32>
    %85 = arith.subf %77, %84 : vector<4x256xf32>
    %86 = vector.broadcast %83 : vector<4x1xf32> to vector<4x256xf32>
    %87 = arith.subf %77, %86 : vector<4x256xf32>
    %88 = arith.mulf %85, %87 : vector<4x256xf32>
    %cst_33 = arith.constant dense<0.000000e+00> : vector<4xf32>
    %89 = vector.multi_reduction <add>, %88, %cst_33 [1] : vector<4x256xf32> to vector<4xf32>
    %90 = vector.shape_cast %89 : vector<4xf32> to vector<4x1xf32>
    %cst_34 = arith.constant 2.560000e+02 : f32
    %91 = vector.broadcast %cst_34 : f32 to vector<4x1xf32>
    %92 = arith.divf %90, %91 : vector<4x1xf32>
    %93 = vector.broadcast %83 : vector<4x1xf32> to vector<4x256xf32>
    %94 = arith.subf %77, %93 : vector<4x256xf32>
    %cst_35 = arith.constant 9.99999996E-13 : f32
    %95 = vector.broadcast %cst_35 : f32 to vector<4x1xf32>
    %96 = arith.addf %92, %95 : vector<4x1xf32>
    %97 = math.rsqrt %96 : vector<4x1xf32>
    %98 = vector.broadcast %97 : vector<4x1xf32> to vector<4x256xf32>
    %99 = arith.mulf %94, %98 : vector<4x256xf32>
    %100 = vector.broadcast %78 : vector<1x256xf32> to vector<4x256xf32>
    %101 = arith.mulf %99, %100 : vector<4x256xf32>
    %102 = vector.broadcast %79 : vector<1x256xf32> to vector<4x256xf32>
    %103 = arith.addf %101, %102 : vector<4x256xf32>
    %c0_36 = arith.constant 0 : index
    %c0_37 = arith.constant 0 : index
    %c0_38 = arith.constant 0 : index
    %104 = vector.load %arg8[%c0_36, %c0_37, %c0_38] : memref<1x4x256xf32, #tpu.memory_space<vmem>>, vector<1x4x256xf32>
    %105 = vector.shape_cast %104 : vector<1x4x256xf32> to vector<4x256xf32>
    %106 = vector.shape_cast %103 : vector<4x256xf32> to vector<1x4x256xf32>
    tpu.vector_store %arg8[%c0_36, %c0_37, %c0_38], %106 {strides = array<i32>} : memref<1x4x256xf32, #tpu.memory_space<vmem>>, vector<1x4x256xf32>,
    return
  }
  func.func @transform_0(%arg0: i32) -> (i32, i32, i32) {
    %c0_i32 = arith.constant 0 : i32
    %c0_i32_0 = arith.constant 0 : i32
    %c0_i32_1 = arith.constant 0 : i32
    return %arg0, %c0_i32, %c0_i32_0 : i32, i32, i32
  }
  func.func @transform_1(%arg0: i32) -> (i32, i32) {
    %c0_i32 = arith.constant 0 : i32
    %c0_i32_0 = arith.constant 0 : i32
    %c0_i32_1 = arith.constant 0 : i32
    return %c0_i32, %c0_i32_0 : i32, i32
  }
  func.func @transform_2(%arg0: i32) -> (i32, i32) {
    %c0_i32 = arith.constant 0 : i32
    %c0_i32_0 = arith.constant 0 : i32
    %c0_i32_1 = arith.constant 0 : i32
    return %c0_i32, %c0_i32_0 : i32, i32
  }
  func.func @transform_3(%arg0: i32) -> (i32, i32) {
    %c0_i32 = arith.constant 0 : i32
    %c0_i32_0 = arith.constant 0 : i32
    %c0_i32_1 = arith.constant 0 : i32
    return %c0_i32, %c0_i32_0 : i32, i32
  }
  func.func @transform_4(%arg0: i32) -> (i32, i32) {
    %c0_i32 = arith.constant 0 : i32
    %c0_i32_0 = arith.constant 0 : i32
    %c0_i32_1 = arith.constant 0 : i32
    return %c0_i32, %c0_i32_0 : i32, i32
  }
  func.func @transform_5(%arg0: i32) -> (i32, i32) {
    %c0_i32 = arith.constant 0 : i32
    %c0_i32_0 = arith.constant 0 : i32
    %c0_i32_1 = arith.constant 0 : i32
    return %c0_i32, %c0_i32_0 : i32, i32
  }
  func.func @transform_6(%arg0: i32) -> (i32, i32) {
    %c0_i32 = arith.constant 0 : i32
    %c0_i32_0 = arith.constant 0 : i32
    %c0_i32_1 = arith.constant 0 : i32
    return %c0_i32, %c0_i32_0 : i32, i32
  }
  func.func @transform_7(%arg0: i32) -> (i32, i32, i32) {
    %c0_i32 = arith.constant 0 : i32
    %c0_i32_0 = arith.constant 0 : i32
    %c0_i32_1 = arith.constant 0 : i32
    return %arg0, %c0_i32, %c0_i32_0 : i32, i32, i32
  }
}

</mosaic_0001>

<bundles_post_ra>
// kernel: tpu_custom_call.1
= control target key start
LH: loop header
LB: loop body
LE: loop exit
PB: predicated region body
PF: predicated region fallthrough
CT: control target
= control target key end

     0   :  { %s2493_s0 = inlined_call_operand.hbm [shape: f32[16,4,256], index: 0, kind: input, shape index: {}]   ;;  %s2494_s1 = inlined_call_operand.hbm [shape: f32[256,768], index: 1, kind: input, shape index: {}]   ;;  %s2495_s2 = inlined_call_operand.hbm [shape: f32[1,768], index: 2, kind: input, shape index: {}]   ;;  %s2496_s3 = inlined_call_operand.hbm [shape: f32[256,256], index: 3, kind: input, shape index: {}]   ;;  %s2497_s4 = inlined_call_operand.vmem [shape: f32[1,256], index: 4, kind: input, shape index: {}]   ;;  %s2498_s5 = inlined_call_operand.vmem [shape: f32[1,256], index: 5, kind: input, shape index: {}]   ;;  %s2499_s6 = inlined_call_operand.vmem [shape: f32[1,256], index: 6, kind: input, shape index: {}]   ;;  %s2500_s7 = inlined_call_operand.hbm [shape: f32[16,4,256], index: 7, kind: output, shape index: {}]  }
   0x1   :  { %2505 = sst [smem:[#allocation15_spill]] %s2494_s1 }
   0x2   :  { %2506 = sst [smem:[#allocation16_spill]] %s2495_s2 }
   0x3   :  { %12 = vsyncpa [#allocation3], 0 }
   0x4   :  { %14 = vsyncpa [#allocation3 + $0x1], 0 }
   0x5   :  { %15 = vsyncpa [#allocation6], 0 }
   0x6   :  { %16 = vsyncpa [#allocation9], 0 }
   0x7   :  { %17 = vsyncpa [#allocation4], 0 }
   0x8   :  { %19 = vsyncpa [#allocation4 + $0x1], 0  ;;  %s2201_s24 = smov 0   ;;  %s2203_s25 = smov 0  }
   0x9   :  { %s2205_s26 = smov 0   ;;  %s2207_s27 = smov 0  }
   0xa LB: > { %s2222_s28 = sadd.s32 4294967295, %s2147_s27   ;;  %s1767_s29 = sadd.s32 4294967294, %s2147_s27   ;;  %s2147_s27 = sphi %s2207_s27, %s2527_s27   ;;  %s2143_s26 = sphi %s2205_s26, %s2526_s26   ;;  %s2139_s25 = sphi %s2203_s25, %s2525_s25   ;;  %s2135_s24 = sphi %s2201_s24, %s2524_s24  }
   0xb   : > { %p45_p0 = scmp.ne.s32.totalorder %s2139_s25, %s2135_s24  ;;  %p2501_p1 = scmp.eq.s32.totalorder %s2222_s28, 0 }
   0xc   : > { %p201_p3 = scmp.eq.s32.totalorder %s1767_s29, 15  ;;  %p1768_p5 = scmp.ge.s32.totalorder %s2147_s27, 1 }
   0xd   : > { %p2231_p4 = por %p2501_p1, %p45_p0  ;;  %p208_p7 = scmp.lt.s32.totalorder %s2147_s27, 17 }
   0xe   : > { %p2236_p6 = por %p201_p3, %p45_p0  ;;  %s2149_s10 = smov [#allocation5]  }
   0xf   : > { %s2507_s30 = scalar_select %p2231_p4, 1, 0 }
  0x10   : > { %s2508_s8 = scalar_select %p2236_p6, 1, 0 }
  0x11   : > { %p2241_p8 = pnand %p1768_p5, %p208_p7  ;;  %s220_s11 = sshll.u32 %s2149_s10, 4  ;;  %s221_s11 = int_to_ptr.vmem [resolvable:$true] %s220_s11 }
  0x12   : > { %s2150_s13 = smov [#allocation7]   ;;  %s2151_s15 = smov [#allocation8]  }
  0x13   : > { %s2509_s9 = scalar_select %p2241_p8, 1, 0 }
  0x14   : > { %p1877_p9 = pneg %p2241_p8  ;;  %s234_s14 = sshll.u32 %s2150_s13, 4  ;;  %s235_s14 = int_to_ptr.vmem [resolvable:$true] %s234_s14 }
  0x15   : > { %s244_s16 = sshll.u32 %s2151_s15, 4  ;;  %s1980_s17 = scalar_lea.vmem %s221_s11, 24576  ;;  %s245_s16 = int_to_ptr.vmem [resolvable:$true] %s244_s16 }
  0x16   : > { %p2249_p10 = pnand %p1877_p9, %p2501_p1  ;;  %p1981_p12 = scmp.ne.s32.totalorder %s221_s11, %s1980_s17 }
  0x17   : > { %p1988_p3 = scmp.lt.s32.totalorder %s221_s11, %s221_s11  ;;  %p1989_p5 = scmp.lt.s32.totalorder %s1980_s17, %s1980_s17 }
  0x18   : > { %p1971_p11 = pneg %p2249_p10 }
  0x19   : > { %p1990_p7 = por %p1989_p5, %p1988_p3 }
  0x1a   : > { %p1983_p13 = pnand %p1981_p12, %p1971_p11 }
  0x1c   : > { %p1984_p0 = pneg %p1983_p13 }
  0x1e   : > { %p1991_p9 = pnand %p1990_p7, %p1984_p0 }
  0x20   : > { %1994 = shalt.err (!%p1991_p9)
}
  0x21   : > { %s2152_s18 = smov 768   ;;  %s2153_s19 = smov 48  }
  0x22   : > { %s2511_s1 = sld [smem:[#allocation15_spill]]  ;;  %s2006_s22 = scalar_lea.vmem %s235_s14, 96 }
  0x23   : > { %p2007_p1 = scmp.ne.s32.totalorder %s235_s14, %s2006_s22  ;;  %p2014_p2 = scmp.lt.s32.totalorder %s235_s14, %s235_s14 }
  0x24   : > { %p2015_p6 = scmp.lt.s32.totalorder %s2006_s22, %s2006_s22 }
  0x25   : > { %p2009_p12 = pnand %p2007_p1, %p1971_p11 }
  0x26   : > { %p2016_p3 = por %p2015_p6, %p2014_p2 }
  0x27   : > { %p2010_p13 = pneg %p2009_p12 }
  0x28   : > { %1880 = dma.hbm_to_vmem [thread:$0]  (!%p2249_p10), %s2511_s1, 24576, %s221_s11, [#allocation6], %s2152_s18, %s2152_s18, %s2153_s19  }
  0x29   : > { %p2017_p0 = pnand %p2016_p3, %p2010_p13 }
  0x2b   : > { %2020 = shalt.err (!%p2017_p0)
}
  0x2c   : > { %s2512_s2 = sld [smem:[#allocation16_spill]]  ;;  %s2032_s10 = scalar_lea.vmem %s245_s16, 8192 }
  0x2d   : > { %p2033_p5 = scmp.ne.s32.totalorder %s245_s16, %s2032_s10  ;;  %p2040_p9 = scmp.lt.s32.totalorder %s245_s16, %s245_s16 }
  0x2e   : > { %p2041_p12 = scmp.lt.s32.totalorder %s2032_s10, %s2032_s10 }
  0x2f   : > { %p2035_p7 = pnand %p2033_p5, %p1971_p11 }
  0x30   : > { %p2042_p4 = por %p2041_p12, %p2040_p9 }
  0x31   : > { %p2036_p1 = pneg %p2035_p7 }
  0x32   : > { %1883 = dma.hbm_to_vmem [thread:$0]  (!%p2249_p10), %s2512_s2, 96, %s235_s14, [#allocation6]  }
  0x33   : > { %p2043_p2 = pnand %p2042_p4, %p2036_p1 }
  0x35   : > { %2046 = shalt.err (!%p2043_p2)
}
  0x36   : > { %s2154_s11 = smov 256   ;;  %s2155_s13 = smov 16  }
  0x37   : > { %1886 = dma.hbm_to_vmem [thread:$0]  (!%p2249_p10), %s2496_s3, 8192, %s245_s16, [#allocation9], %s2154_s11, %s2154_s11, %s2155_s13  }
  0x38   : > { %s2280_s17 = sadd.s32 1, %s2147_s27   ;;  %s32_s19 = sadd.s32 1, %s2143_s26 }
  0x39   : > { %s29_s18 = ssub.s32 %s2147_s27, %s2280_s17  ;;  %p39_p6 = scmp.ne.s32.totalorder %s2143_s26, %s2139_s25 }
  0x3a   : > { %p30_p4 = scmp.eq.s32.totalorder %s29_s18, 0  ;;  %p40_p11 = scmp.eq.s32.totalorder %s2147_s27, 0 }
  0x3b   : > { %p1898_p13 = scmp.lt.s32.totalorder %s2147_s27, 16  ;;  %p2513_p0 = scmp.eq.s32.totalorder %s2222_s28, 15 }
  0x3c   : > { %s2290_s20 = scalar_select %p30_p4, %s2143_s26, %s32_s19  }
  0x3d   : > { %p41_p3 = por %p40_p11, %p39_p6  ;;  %p2294_p5 = por %p2513_p0, %p39_p6 }
  0x3e   : > { %s267_s12 = sand.u32 1, %s2143_s26   ;;  %s1803_s22 = sshll.u32 %s2147_s27, 7 }
  0x3f   : > { %s2514_s21 = scalar_select %p2294_p5, 1, 0 }
  0x40   : > { %s1773_s16 = sshll.u32 %s267_s12, 3  ;;  %s2303_s10 = scalar_lea.hbm %s2493_s0, %s1803_s22 }
  0x41   : > { %s271_s11 = scalar_lea.vmem [#allocation2], %s1773_s16  ;;  %p2305_p10 = pnand %p1898_p13, %p41_p3 }
  0x42   : > { %s279_s13 = sshll.u32 %s271_s11, 4  ;;  %s268_s15 = scalar_lea.sflag [#allocation3], %s267_s12  ;;  %s280_s13 = int_to_ptr.vmem [resolvable:$true] %s279_s13 }
  0x43   : > { %s2047_s18 = scalar_lea.hbm %s2303_s10, 128  ;;  %p2049_p1 = pneg %p2305_p10 }
  0x44   : > { %p2048_p7 = scmp.ne.s32.totalorder %s2303_s10, %s2047_s18  ;;  %s2052_s23 = scalar_lea.hbm %s2493_s0, 2048 }
  0x45   : > { %p2053_p2 = scmp.lt.s32.totalorder %s2303_s10, %s2493_s0  ;;  %p2054_p4 = scmp.lt.s32.totalorder %s2052_s23, %s2047_s18 }
  0x46   : > { %p2050_p9 = pnand %p2049_p1, %p2048_p7 }
  0x47   : > { %p2055_p6 = por %p2054_p4, %p2053_p2 }
  0x48   : > { %p2051_p12 = pneg %p2050_p9 }
  0x4a   : > { %p2056_p11 = pnand %p2055_p6, %p2051_p12 }
  0x4c   : > { %2059 = shalt.err (!%p2056_p11)
}
  0x4d   : > { %s2060_s11 = scalar_lea.vmem %s280_s13, 128  ;;  %s2156_s12 = smov [#allocation2]  }
  0x4e   : > { %p2061_p13 = scmp.ne.s32.totalorder %s280_s13, %s2060_s11  ;;  %s2065_s1 = sshll.u32 %s2156_s12, 4  ;;  %s2066_s1 = int_to_ptr.vmem [resolvable:$false] %s2065_s1 }
  0x4f   : > { %s2067_s2 = scalar_lea.vmem %s2066_s1, 256  ;;  %p2068_p7 = scmp.lt.s32.totalorder %s280_s13, %s2066_s1 }
  0x50   : > { %p2063_p3 = pnand %p2061_p13, %p2049_p1  ;;  %p2069_p9 = scmp.lt.s32.totalorder %s2067_s2, %s2060_s11 }
  0x52   : > { %p2064_p0 = pneg %p2063_p3  ;;  %p2070_p5 = por %p2069_p9, %p2068_p7 }
  0x54   : > { %p2071_p8 = pnand %p2070_p5, %p2064_p0 }
  0x56   : > { %2074 = shalt.err (!%p2071_p8)
}
  0x57   : > { %1890 = dma.hbm_to_vmem [thread:$0]  (!%p2305_p10), %s2303_s10, 128, %s280_s13, %s268_s15  }
  0x58   : > { %p2516_p12 = scmp.ne.s32.totalorder %s2509_s9, 0 }
  0x59   : > { %s2326_s18 = sand.u32 (!%p2516_p12), 1, %s2139_s25   ;;  %p2517_p8 = scmp.ne.s32.totalorder (!%p2516_p12), %s2507_s30, 0 }
  0x5a   : > { %288 = sbr.rel (%p2516_p12) target bundleno = 2229 (0x8b5), region = 48  ;;  %s1777_s19 = sshll.u32 (!%p2516_p12), %s2326_s18, 3 }
  0x5b   : > { %s291_s1 = scalar_lea.sflag (!%p2516_p12), [#allocation3], %s2326_s18  ;;  %s2332_s2 = scalar_lea.vmem (!%p2516_p12), [#allocation2], %s1777_s19 }
  0x5f   : > { %2118 = dma.done.wait (%p2517_p8), %s291_s1, 128  }
  0x60   : > { %2120 = vsyncadd (%p2517_p8), %s291_s1, 4294967168  ;;  %p2518_p5 = scmp.eq.s32.totalorder %s2222_s28, 0 }
  0x62   : > { %2122 = dma.done.wait (%p2518_p5), [#allocation6], 24672   ;;  %p2519_p10 = pmov %p2518_p5 }
  0x63   : > { %p2520_p1 = pmov %p2518_p5 }
  0x64   : > { %2124 = vsyncadd (%p2519_p10), [#allocation6], 4294942624 }
  0x65   : > { %2126 = dma.done.wait (%p2520_p1), [#allocation9], 8192   ;;  %p2521_p2 = pmov %p2520_p1 }
  0x66   : > { %v431_v0 = vld [vmem:[#allocation5 + $0x2e8] sm:$0xff]  ;;  %v430_v1 = vld [vmem:[#allocation5 + $0x2e0] sm:$0xff]  ;;  %v429_v2 = vld [vmem:[#allocation5 + $0x2d8] sm:$0xff]  ;;  %vm2158_vm0 = vmmov 0   ;;  %vm778_vm1 = vcmask 523264   ;;  %s2159_s30 = smov 64  }
  0x67   : > { %2128 = vsyncadd (%p2521_p2), [#allocation9], 4294959104  ;;  %636 = vmatprep.subr.mxu1 %v431_v0  ;;  %565 = vmatprep.subr.mxu0 %v429_v2  ;;  %v425_v3 = vld [vmem:[#allocation5 + $0x2b8] sm:$0xff]  ;;  %v428_v4 = vld [vmem:[#allocation5 + $0x2d0] sm:$0xff]  ;;  %vm871_vm2 = vcmask 1043456   ;;  %vm855_vm3 = vcmask 27648  }
  0x68   : > { %v424_v5 = vld [vmem:[#allocation5 + $0x2b0] sm:$0xff]  ;;  %637 = vmatpush1.msra.mxu1 %v430_v1  ;;  %566 = vmatpush1.msra.mxu0 %v428_v4  ;;  %v423_v6 = vld [vmem:[#allocation5 + $0x2a8] sm:$0xff]  ;;  %v422_v8 = vld [vmem:[#allocation5 + $0x2a0] sm:$0xff]  ;;  %vm867_vm4 = vcmask 31744   ;;  %s1804_s23 = sshll.u32 %s2222_s28, 7  ;;  %s336_s29 = scalar_lea.vmem [#allocation10], %s1777_s19 }
  0x69   : > { %v419_v7 = vld [vmem:[#allocation5 + $0x288] sm:$0xff]  ;;  %638 = vmatprep.subr.mxu1 %v425_v3  ;;  %567 = vmatprep.subr.mxu0 %v423_v6  ;;  %v418_v9 = vld [vmem:[#allocation5 + $0x280] sm:$0xff]  ;;  %v417_v10 = vld [vmem:[#allocation5 + $0x278] sm:$0xff]  ;;  %s1668_s16 = sshll.u32 %s336_s29, 4  ;;  %s1666_s1 = scalar_lea.hbm %s2500_s7, %s1804_s23  ;;  %s1669_s16 = int_to_ptr.vmem [resolvable:$true] %s1668_s16 }
  0x6a   : > { %639 = vmatpush1.msra.mxu1 %v424_v5  ;;  %568 = vmatpush1.msra.mxu0 %v422_v8  ;;  %v413_v11 = vld [vmem:[#allocation5 + $0x258] sm:$0xff]  ;;  %v416_v12 = vld [vmem:[#allocation5 + $0x270] sm:$0xff]  ;;  %v411_v13 = vld [vmem:[#allocation5 + $0x248] sm:$0xff]  ;;  %p2522_p6 = scmp.ne.s32.totalorder %s2514_s21, 0  ;;  %s2160_s9 = smov [#allocation10]  }
  0x6b   : > { %640 = vmatprep.subr.mxu1 %v419_v7  ;;  %569 = vmatprep.subr.mxu0 %v417_v10  ;;  %v412_v14 = vld [vmem:[#allocation5 + $0x250] sm:$0xff]  ;;  %v410_v15 = vld [vmem:[#allocation5 + $0x240] sm:$0xff]  ;;  %v407_v16 = vld [vmem:[#allocation5 + $0x228] sm:$0xff]  ;;  %s2079_s28 = sshll.u32 %s2160_s9, 4  ;;  %s2080_s28 = int_to_ptr.vmem [resolvable:$false] %s2079_s28 }
  0x6c   : > { %641 = vmatpush1.msra.mxu1 %v418_v9  ;;  %570 = vmatpush1.msra.mxu0 %v416_v12  ;;  %v405_v17 = vld [vmem:[#allocation5 + $0x218] sm:$0xff]  ;;  %v406_v18 = vld [vmem:[#allocation5 + $0x220] sm:$0xff]  ;;  %v404_v19 = vld [vmem:[#allocation5 + $0x210] sm:$0xff]  ;;  %s2081_s19 = scalar_lea.vmem %s2080_s28, 256  ;;  %p2082_p3 = scmp.lt.s32.totalorder %s1669_s16, %s2080_s28 }
  0x6d   : > { %642 = vmatprep.subr.mxu1 %v413_v11  ;;  %571 = vmatprep.subr.mxu0 %v411_v13  ;;  %v401_v20 = vld [vmem:[#allocation5 + $0x1f8] sm:$0xff]  ;;  %v399_v21 = vld [vmem:[#allocation5 + $0x1e8] sm:$0xff]  ;;  %v400_v22 = vld [vmem:[#allocation5 + $0x1f0] sm:$0xff] }
  0x6e   : > { %643 = vmatpush1.msra.mxu1 %v412_v14  ;;  %572 = vmatpush1.msra.mxu0 %v410_v15  ;;  %v398_v23 = vld [vmem:[#allocation5 + $0x1e0] sm:$0xff]  ;;  %v395_v24 = vld [vmem:[#allocation5 + $0x1c8] sm:$0xff]  ;;  %v393_v25 = vld [vmem:[#allocation5 + $0x1b8] sm:$0xff] }
  0x6f   : > { %644 = vmatprep.subr.mxu1 %v407_v16  ;;  %573 = vmatprep.subr.mxu0 %v405_v17  ;;  %v394_v26 = vld [vmem:[#allocation5 + $0x1c0] sm:$0xff]  ;;  %v392_v27 = vld [vmem:[#allocation5 + $0x1b0] sm:$0xff]  ;;  %v389_v28 = vld [vmem:[#allocation5 + $0x198] sm:$0xff] }
  0x70   : > { %645 = vmatpush1.msra.mxu1 %v406_v18  ;;  %574 = vmatpush1.msra.mxu0 %v404_v19  ;;  %v387_v29 = vld [vmem:[#allocation5 + $0x188] sm:$0xff]  ;;  %v388_v30 = vld [vmem:[#allocation5 + $0x190] sm:$0xff]  ;;  %v386_v31 = vld [vmem:[#allocation5 + $0x180] sm:$0xff] }
  0x71   : > { %646 = vmatprep.subr.mxu1 %v401_v20  ;;  %575 = vmatprep.subr.mxu0 %v399_v21  ;;  %v383_v32 = vld [vmem:[#allocation5 + $0x168] sm:$0xff]  ;;  %v381_v33 = vld [vmem:[#allocation5 + $0x158] sm:$0xff]  ;;  %v382_v34 = vld [vmem:[#allocation5 + $0x160] sm:$0xff] }
  0x72   : > { %647 = vmatpush1.msra.mxu1 %v400_v22  ;;  %576 = vmatpush1.msra.mxu0 %v398_v23  ;;  %v380_v35 = vld [vmem:[#allocation5 + $0x150] sm:$0xff]  ;;  %v377_v36 = vld [vmem:[#allocation5 + $0x138] sm:$0xff]  ;;  %v375_v37 = vld [vmem:[#allocation5 + $0x128] sm:$0xff] }
  0x73   : > { %648 = vmatprep.subr.mxu1 %v395_v24  ;;  %577 = vmatprep.subr.mxu0 %v393_v25  ;;  %v376_v38 = vld [vmem:[#allocation5 + $0x130] sm:$0xff]  ;;  %v374_v39 = vld [vmem:[#allocation5 + $0x120] sm:$0xff]  ;;  %v371_v40 = vld [vmem:[#allocation5 + $0x108] sm:$0xff] }
  0x74   : > { %649 = vmatpush1.msra.mxu1 %v394_v26  ;;  %578 = vmatpush1.msra.mxu0 %v392_v27  ;;  %v369_v41 = vld [vmem:[#allocation5 + $0xf8] sm:$0xff]  ;;  %v370_v42 = vld [vmem:[#allocation5 + $0x100] sm:$0xff]  ;;  %v368_v43 = vld [vmem:[#allocation5 + $0xf0] sm:$0xff] }
  0x75   : > { %650 = vmatprep.subr.mxu1 %v389_v28  ;;  %579 = vmatprep.subr.mxu0 %v387_v29  ;;  %v365_v44 = vld [vmem:[#allocation5 + $0xd8] sm:$0xff]  ;;  %v363_v45 = vld [vmem:[#allocation5 + $0xc8] sm:$0xff]  ;;  %v364_v46 = vld [vmem:[#allocation5 + $0xd0] sm:$0xff] }
  0x76   : > { %651 = vmatpush1.msra.mxu1 %v388_v30  ;;  %580 = vmatpush1.msra.mxu0 %v386_v31  ;;  %v362_v47 = vld [vmem:[#allocation5 + $0xc0] sm:$0xff]  ;;  %v359_v48 = vld [vmem:[#allocation5 + $0xa8] sm:$0xff]  ;;  %v357_v49 = vld [vmem:[#allocation5 + $0x98] sm:$0xff] }
  0x77   : > { %652 = vmatprep.subr.mxu1 %v383_v32  ;;  %581 = vmatprep.subr.mxu0 %v381_v33  ;;  %v358_v50 = vld [vmem:[#allocation5 + $0xa0] sm:$0xff]  ;;  %v356_v51 = vld [vmem:[#allocation5 + $0x90] sm:$0xff]  ;;  %v353_v52 = vld [vmem:[#allocation5 + $0x78] sm:$0xff] }
  0x78   : > { %653 = vmatpush1.msra.mxu1 %v382_v34  ;;  %582 = vmatpush1.msra.mxu0 %v380_v35  ;;  %v351_v53 = vld [vmem:[#allocation5 + $0x68] sm:$0xff]  ;;  %v352_v54 = vld [vmem:[#allocation5 + $0x70] sm:$0xff]  ;;  %v350_v55 = vld [vmem:[#allocation5 + $0x60] sm:$0xff] }
  0x79   : > { %654 = vmatprep.subr.mxu1 %v377_v36  ;;  %583 = vmatprep.subr.mxu0 %v375_v37  ;;  %v347_v56 = vld [vmem:[#allocation5 + $0x48] sm:$0xff]  ;;  %v345_v57 = vld [vmem:[#allocation5 + $0x38] sm:$0xff]  ;;  %v346_v58 = vld [vmem:[#allocation5 + $0x40] sm:$0xff] }
  0x7a   : > { %655 = vmatpush1.msra.mxu1 %v376_v38  ;;  %584 = vmatpush1.msra.mxu0 %v374_v39  ;;  %v344_v59 = vld [vmem:[#allocation5 + $0x30] sm:$0xff]  ;;  %v341_v60 = vld [vmem:[#allocation5 + $0x18] sm:$0xff]  ;;  %v339_v61 = vld [vmem:[#allocation5 + $0x8] sm:$0xff] }
  0x7b   : > { %656 = vmatprep.subr.mxu1 %v371_v40  ;;  %585 = vmatprep.subr.mxu0 %v369_v41  ;;  %v340_v62 = vld [vmem:[#allocation5 + $0x10] sm:$0xff]  ;;  %v338_v63 = vld [vmem:[#allocation5] sm:$0xff]  ;;  %v527_v0 = vld [vmem:[#allocation5 + $0x5e8] sm:$0xff] }
  0x7c   : > { %657 = vmatpush1.msra.mxu1 %v370_v42  ;;  %586 = vmatpush1.msra.mxu0 %v368_v43  ;;  %v525_v1 = vld [vmem:[#allocation5 + $0x5d8] sm:$0xff]  ;;  %v526_v2 = vld [vmem:[#allocation5 + $0x5e0] sm:$0xff]  ;;  %v524_v3 = vld [vmem:[#allocation5 + $0x5d0] sm:$0xff] }
  0x7d   : > { %658 = vmatprep.subr.mxu1 %v365_v44  ;;  %587 = vmatprep.subr.mxu0 %v363_v45  ;;  %v521_v4 = vld [vmem:[#allocation5 + $0x5b8] sm:$0xff]  ;;  %v519_v5 = vld [vmem:[#allocation5 + $0x5a8] sm:$0xff]  ;;  %v520_v6 = vld [vmem:[#allocation5 + $0x5b0] sm:$0xff] }
  0x7e   : > { %659 = vmatpush1.msra.mxu1 %v364_v46  ;;  %588 = vmatpush1.msra.mxu0 %v362_v47  ;;  %v518_v7 = vld [vmem:[#allocation5 + $0x5a0] sm:$0xff]  ;;  %v515_v8 = vld [vmem:[#allocation5 + $0x588] sm:$0xff]  ;;  %v513_v9 = vld [vmem:[#allocation5 + $0x578] sm:$0xff] }
  0x7f   : > { %660 = vmatprep.subr.mxu1 %v359_v48  ;;  %589 = vmatprep.subr.mxu0 %v357_v49  ;;  %v514_v10 = vld [vmem:[#allocation5 + $0x580] sm:$0xff]  ;;  %v512_v11 = vld [vmem:[#allocation5 + $0x570] sm:$0xff]  ;;  %v509_v12 = vld [vmem:[#allocation5 + $0x558] sm:$0xff] }
  0x80   : > { %661 = vmatpush1.msra.mxu1 %v358_v50  ;;  %590 = vmatpush1.msra.mxu0 %v356_v51  ;;  %v507_v13 = vld [vmem:[#allocation5 + $0x548] sm:$0xff]  ;;  %v508_v14 = vld [vmem:[#allocation5 + $0x550] sm:$0xff]  ;;  %v506_v15 = vld [vmem:[#allocation5 + $0x540] sm:$0xff] }
  0x81   : > { %662 = vmatprep.subr.mxu1 %v353_v52  ;;  %591 = vmatprep.subr.mxu0 %v351_v53  ;;  %v503_v16 = vld [vmem:[#allocation5 + $0x528] sm:$0xff]  ;;  %v501_v17 = vld [vmem:[#allocation5 + $0x518] sm:$0xff]  ;;  %v502_v18 = vld [vmem:[#allocation5 + $0x520] sm:$0xff] }
  0x82   : > { %663 = vmatpush1.msra.mxu1 %v352_v54  ;;  %592 = vmatpush1.msra.mxu0 %v350_v55  ;;  %v500_v19 = vld [vmem:[#allocation5 + $0x510] sm:$0xff]  ;;  %v497_v20 = vld [vmem:[#allocation5 + $0x4f8] sm:$0xff]  ;;  %v495_v21 = vld [vmem:[#allocation5 + $0x4e8] sm:$0xff] }
  0x83   : > { %664 = vmatprep.subr.mxu1 %v347_v56  ;;  %593 = vmatprep.subr.mxu0 %v345_v57  ;;  %v496_v22 = vld [vmem:[#allocation5 + $0x4f0] sm:$0xff]  ;;  %v494_v23 = vld [vmem:[#allocation5 + $0x4e0] sm:$0xff]  ;;  %v491_v24 = vld [vmem:[#allocation5 + $0x4c8] sm:$0xff] }
  0x84   : > { %665 = vmatpush1.msra.mxu1 %v346_v58  ;;  %594 = vmatpush1.msra.mxu0 %v344_v59  ;;  %v489_v25 = vld [vmem:[#allocation5 + $0x4b8] sm:$0xff]  ;;  %v490_v26 = vld [vmem:[#allocation5 + $0x4c0] sm:$0xff]  ;;  %v488_v27 = vld [vmem:[#allocation5 + $0x4b0] sm:$0xff] }
  0x85   : > { %666 = vmatprep.subr.mxu1 %v341_v60  ;;  %595 = vmatprep.subr.mxu0 %v339_v61  ;;  %v485_v28 = vld [vmem:[#allocation5 + $0x498] sm:$0xff]  ;;  %v483_v29 = vld [vmem:[#allocation5 + $0x488] sm:$0xff]  ;;  %v484_v30 = vld [vmem:[#allocation5 + $0x490] sm:$0xff] }
  0x86   : > { %667 = vmatpush1.msra.mxu1 %v340_v62  ;;  %596 = vmatpush1.msra.mxu0 %v338_v63  ;;  %v482_v31 = vld [vmem:[#allocation5 + $0x480] sm:$0xff]  ;;  %v479_v32 = vld [vmem:[#allocation5 + $0x468] sm:$0xff]  ;;  %v477_v33 = vld [vmem:[#allocation5 + $0x458] sm:$0xff] }
  0x87   : > { %668 = vmatprep.subr.mxu1 %v527_v0  ;;  %597 = vmatprep.subr.mxu0 %v525_v1  ;;  %v478_v34 = vld [vmem:[#allocation5 + $0x460] sm:$0xff]  ;;  %v476_v35 = vld [vmem:[#allocation5 + $0x450] sm:$0xff]  ;;  %v473_v36 = vld [vmem:[#allocation5 + $0x438] sm:$0xff] }
  0x88   : > { %669 = vmatpush2.msra.mxu1 %v526_v2  ;;  %598 = vmatpush2.msra.mxu0 %v524_v3  ;;  %v471_v37 = vld [vmem:[#allocation5 + $0x428] sm:$0xff]  ;;  %v472_v38 = vld [vmem:[#allocation5 + $0x430] sm:$0xff]  ;;  %v470_v39 = vld [vmem:[#allocation5 + $0x420] sm:$0xff] }
  0x89   : > { %670 = vmatprep.subr.mxu1 %v521_v4  ;;  %599 = vmatprep.subr.mxu0 %v519_v5  ;;  %v467_v40 = vld [vmem:[#allocation5 + $0x408] sm:$0xff]  ;;  %v465_v41 = vld [vmem:[#allocation5 + $0x3f8] sm:$0xff]  ;;  %v466_v42 = vld [vmem:[#allocation5 + $0x400] sm:$0xff] }
  0x8a   : > { %671 = vmatpush2.msra.mxu1 %v520_v6  ;;  %600 = vmatpush2.msra.mxu0 %v518_v7  ;;  %v464_v43 = vld [vmem:[#allocation5 + $0x3f0] sm:$0xff]  ;;  %v461_v44 = vld [vmem:[#allocation5 + $0x3d8] sm:$0xff]  ;;  %v459_v45 = vld [vmem:[#allocation5 + $0x3c8] sm:$0xff] }
  0x8b   : > { %672 = vmatprep.subr.mxu1 %v515_v8  ;;  %601 = vmatprep.subr.mxu0 %v513_v9  ;;  %v460_v46 = vld [vmem:[#allocation5 + $0x3d0] sm:$0xff]  ;;  %v458_v47 = vld [vmem:[#allocation5 + $0x3c0] sm:$0xff]  ;;  %v455_v48 = vld [vmem:[#allocation5 + $0x3a8] sm:$0xff] }
  0x8c   : > { %673 = vmatpush2.msra.mxu1 %v514_v10  ;;  %602 = vmatpush2.msra.mxu0 %v512_v11  ;;  %v453_v49 = vld [vmem:[#allocation5 + $0x398] sm:$0xff]  ;;  %v454_v50 = vld [vmem:[#allocation5 + $0x3a0] sm:$0xff]  ;;  %v452_v51 = vld [vmem:[#allocation5 + $0x390] sm:$0xff] }
  0x8d   : > { %674 = vmatprep.subr.mxu1 %v509_v12  ;;  %603 = vmatprep.subr.mxu0 %v507_v13  ;;  %v449_v52 = vld [vmem:[#allocation5 + $0x378] sm:$0xff]  ;;  %v447_v53 = vld [vmem:[#allocation5 + $0x368] sm:$0xff]  ;;  %v448_v55 = vld [vmem:[#allocation5 + $0x370] sm:$0xff] }
  0x8e   : > { %675 = vmatpush2.msra.mxu1 %v508_v14  ;;  %604 = vmatpush2.msra.mxu0 %v506_v15  ;;  %v2347_v54 = vld [vmem:[%s2332_s2] sm:$0xff]  ;;  %v446_v56 = vld [vmem:[#allocation5 + $0x360] sm:$0xff]  ;;  %v443_v57 = vld [vmem:[#allocation5 + $0x348] sm:$0xff]  ;;  %s1654_s2 = scalar_lea.sflag [#allocation4], %s2326_s18 }
  0x8f   : > { %676 = vmatprep.subr.mxu1 %v503_v16  ;;  %605 = vmatprep.subr.mxu0 %v501_v17  ;;  %v441_v58 = vld [vmem:[#allocation5 + $0x338] sm:$0xff]  ;;  %v442_v59 = vld [vmem:[#allocation5 + $0x340] sm:$0xff]  ;;  %v440_v60 = vld [vmem:[#allocation5 + $0x330] sm:$0xff]  ;;  %v2351_v61 = vcombine.high %v2347_v54, %v2347_v54 }
  0x90   : > { %677 = vmatpush2.msra.mxu1 %v502_v18  ;;  %606 = vmatpush2.msra.mxu0 %v500_v19  ;;  %v437_v62 = vld [vmem:[#allocation5 + $0x318] sm:$0xff]  ;;  %v436_v63 = vld [vmem:[#allocation5 + $0x310] sm:$0xff]  ;;  %v435_v0 = vld [vmem:[#allocation5 + $0x308] sm:$0xff] }
  0x91   : > { %678 = vmatprep.subr.mxu1 %v497_v20  ;;  %607 = vmatprep.subr.mxu0 %v495_v21  ;;  %v434_v1 = vld [vmem:[#allocation5 + $0x300] sm:$0xff]  ;;  %v433_v2 = vld [vmem:[#allocation5 + $0x2f8] sm:$0xff]  ;;  %v432_v3 = vld [vmem:[#allocation5 + $0x2f0] sm:$0xff] }
  0x92   : > { %679 = vmatpush2.msra.mxu1 %v496_v22  ;;  %608 = vmatpush2.msra.mxu0 %v494_v23  ;;  %v427_v4 = vld [vmem:[#allocation5 + $0x2c8] sm:$0xff]  ;;  %v426_v5 = vld [vmem:[#allocation5 + $0x2c0] sm:$0xff]  ;;  %v421_v6 = vld [vmem:[#allocation5 + $0x298] sm:$0xff] }
  0x93   : > { %680 = vmatprep.subr.mxu1 %v491_v24  ;;  %609 = vmatprep.subr.mxu0 %v489_v25  ;;  %v420_v7 = vld [vmem:[#allocation5 + $0x290] sm:$0xff]  ;;  %v415_v8 = vld [vmem:[#allocation5 + $0x268] sm:$0xff]  ;;  %v414_v9 = vld [vmem:[#allocation5 + $0x260] sm:$0xff] }
  0x94   : > { %681 = vmatpush2.msra.mxu1 %v490_v26  ;;  %610 = vmatpush2.msra.mxu0 %v488_v27  ;;  %v409_v10 = vld [vmem:[#allocation5 + $0x238] sm:$0xff]  ;;  %v408_v11 = vld [vmem:[#allocation5 + $0x230] sm:$0xff]  ;;  %v403_v12 = vld [vmem:[#allocation5 + $0x208] sm:$0xff] }
  0x95   : > { %682 = vmatprep.subr.mxu1 %v485_v28  ;;  %611 = vmatprep.subr.mxu0 %v483_v29  ;;  %v402_v13 = vld [vmem:[#allocation5 + $0x200] sm:$0xff]  ;;  %v397_v14 = vld [vmem:[#allocation5 + $0x1d8] sm:$0xff]  ;;  %v396_v15 = vld [vmem:[#allocation5 + $0x1d0] sm:$0xff] }
  0x96   : > { %683 = vmatpush2.msra.mxu1 %v484_v30  ;;  %612 = vmatpush2.msra.mxu0 %v482_v31  ;;  %v391_v16 = vld [vmem:[#allocation5 + $0x1a8] sm:$0xff]  ;;  %v390_v17 = vld [vmem:[#allocation5 + $0x1a0] sm:$0xff]  ;;  %v385_v18 = vld [vmem:[#allocation5 + $0x178] sm:$0xff] }
  0x97   : > { %684 = vmatprep.subr.mxu1 %v479_v32  ;;  %613 = vmatprep.subr.mxu0 %v477_v33  ;;  %v384_v19 = vld [vmem:[#allocation5 + $0x170] sm:$0xff]  ;;  %v379_v20 = vld [vmem:[#allocation5 + $0x148] sm:$0xff]  ;;  %v378_v21 = vld [vmem:[#allocation5 + $0x140] sm:$0xff] }
  0x98   : > { %685 = vmatpush2.msra.mxu1 %v478_v34  ;;  %614 = vmatpush2.msra.mxu0 %v476_v35  ;;  %v373_v22 = vld [vmem:[#allocation5 + $0x118] sm:$0xff]  ;;  %v372_v23 = vld [vmem:[#allocation5 + $0x110] sm:$0xff]  ;;  %v367_v24 = vld [vmem:[#allocation5 + $0xe8] sm:$0xff] }
  0x99   : > { %686 = vmatprep.subr.mxu1 %v473_v36  ;;  %615 = vmatprep.subr.mxu0 %v471_v37  ;;  %v366_v25 = vld [vmem:[#allocation5 + $0xe0] sm:$0xff]  ;;  %v361_v26 = vld [vmem:[#allocation5 + $0xb8] sm:$0xff]  ;;  %v360_v27 = vld [vmem:[#allocation5 + $0xb0] sm:$0xff] }
  0x9a   : > { %687 = vmatpush2.msra.mxu1 %v472_v38  ;;  %616 = vmatpush2.msra.mxu0 %v470_v39  ;;  %v355_v28 = vld [vmem:[#allocation5 + $0x88] sm:$0xff]  ;;  %v354_v29 = vld [vmem:[#allocation5 + $0x80] sm:$0xff]  ;;  %v349_v30 = vld [vmem:[#allocation5 + $0x58] sm:$0xff] }
  0x9b   : > { %688 = vmatprep.subr.mxu1 %v467_v40  ;;  %617 = vmatprep.subr.mxu0 %v465_v41  ;;  %v348_v31 = vld [vmem:[#allocation5 + $0x50] sm:$0xff]  ;;  %v343_v32 = vld [vmem:[#allocation5 + $0x28] sm:$0xff]  ;;  %v342_v33 = vld [vmem:[#allocation5 + $0x20] sm:$0xff] }
  0x9c   : > { %689 = vmatpush2.msra.mxu1 %v466_v42  ;;  %618 = vmatpush2.msra.mxu0 %v464_v43  ;;  %v529_v34 = vld [vmem:[#allocation5 + $0x5f8] sm:$0xff]  ;;  %v528_v35 = vld [vmem:[#allocation5 + $0x5f0] sm:$0xff]  ;;  %v523_v36 = vld [vmem:[#allocation5 + $0x5c8] sm:$0xff] }
  0x9d   : > { %690 = vmatprep.subr.mxu1 %v461_v44  ;;  %619 = vmatprep.subr.mxu0 %v459_v45  ;;  %v522_v37 = vld [vmem:[#allocation5 + $0x5c0] sm:$0xff]  ;;  %v517_v38 = vld [vmem:[#allocation5 + $0x598] sm:$0xff]  ;;  %v516_v39 = vld [vmem:[#allocation5 + $0x590] sm:$0xff] }
  0x9e   : > { %691 = vmatpush2.msra.mxu1 %v460_v46  ;;  %620 = vmatpush2.msra.mxu0 %v458_v47  ;;  %v511_v40 = vld [vmem:[#allocation5 + $0x568] sm:$0xff]  ;;  %v510_v41 = vld [vmem:[#allocation5 + $0x560] sm:$0xff]  ;;  %v505_v42 = vld [vmem:[#allocation5 + $0x538] sm:$0xff] }
  0x9f   : > { %692 = vmatprep.subr.mxu1 %v455_v48  ;;  %621 = vmatprep.subr.mxu0 %v453_v49  ;;  %v504_v43 = vld [vmem:[#allocation5 + $0x530] sm:$0xff]  ;;  %v499_v44 = vld [vmem:[#allocation5 + $0x508] sm:$0xff]  ;;  %v498_v45 = vld [vmem:[#allocation5 + $0x500] sm:$0xff] }
  0xa0   : > { %693 = vmatpush2.msra.mxu1 %v454_v50  ;;  %622 = vmatpush2.msra.mxu0 %v452_v51  ;;  %v493_v46 = vld [vmem:[#allocation5 + $0x4d8] sm:$0xff]  ;;  %v492_v47 = vld [vmem:[#allocation5 + $0x4d0] sm:$0xff]  ;;  %v487_v48 = vld [vmem:[#allocation5 + $0x4a8] sm:$0xff] }
  0xa1   : > { %694 = vmatprep.subr.mxu1 %v449_v52  ;;  %623 = vmatprep.subr.mxu0 %v447_v53  ;;  %v486_v49 = vld [vmem:[#allocation5 + $0x4a0] sm:$0xff]  ;;  %v481_v50 = vld [vmem:[#allocation5 + $0x478] sm:$0xff]  ;;  %v480_v51 = vld [vmem:[#allocation5 + $0x470] sm:$0xff] }
  0xa2   : > { %695 = vmatpush2.msra.mxu1 %v448_v55  ;;  %624 = vmatpush2.msra.mxu0 %v446_v56  ;;  %v475_v52 = vld [vmem:[#allocation5 + $0x448] sm:$0xff]  ;;  %v474_v53 = vld [vmem:[#allocation5 + $0x440] sm:$0xff]  ;;  %v469_v55 = vld [vmem:[#allocation5 + $0x418] sm:$0xff] }
  0xa3   : > { %696 = vmatprep.subr.mxu1 %v443_v57  ;;  %625 = vmatprep.subr.mxu0 %v441_v58  ;;  %v468_v56 = vld [vmem:[#allocation5 + $0x410] sm:$0xff]  ;;  %v463_v57 = vld [vmem:[#allocation5 + $0x3e8] sm:$0xff]  ;;  %v462_v58 = vld [vmem:[#allocation5 + $0x3e0] sm:$0xff] }
  0xa4   : > { %697 = vmatpush2.msra.mxu1 %v442_v59  ;;  %626 = vmatpush2.msra.mxu0 %v440_v60  ;;  %v457_v59 = vld [vmem:[#allocation5 + $0x3b8] sm:$0xff]  ;;  %v456_v60 = vld [vmem:[#allocation5 + $0x3b0] sm:$0xff] }
  0xa5   : > { %698 = vmatprep.subr.mxu1 %v437_v62  ;;  %700 = vmatprep.mubr.f32.mxu1 %v2351_v61  ;;  %v451_v62 = vld [vmem:[#allocation5 + $0x388] sm:$0xff] }
  0xa6   : > { %699 = vmatpush2.msra.mxu1 %v436_v63  ;;  %627 = vmatprep.subr.mxu0 %v435_v0  ;;  %v450_v63 = vld [vmem:[#allocation5 + $0x380] sm:$0xff]  ;;  %v445_v0 = vld [vmem:[#allocation5 + $0x358] sm:$0xff] }
  0xa7   : > { %701 = vmatmul.mubr.f32.vlgmr.msra.gmra.mxu1 %v2347_v54  ;;  %628 = vmatpush2.msra.mxu0 %v434_v1  ;;  %v444_v1 = vld [vmem:[#allocation5 + $0x350] sm:$0xff] }
  0xa8   : > { %629 = vmatprep.mubr.f32.mxu0 %v2351_v61  ;;  %707 = vmatprep.subr.mxu0 %v433_v2  ;;  %v439_v2 = vld [vmem:[#allocation5 + $0x328] sm:$0xff] }
  0xa9   : > { %630 = vmatmul.mubr.f32.vlgmr.msra.gmra.mxu0 %v2347_v54 }
  0xaa   : > { %708 = vmatpush1.msra.mxu0 %v432_v3  ;;  %771 = vmatprep.mubr.f32.mxu0 %v2351_v61  ;;  %v438_v3 = vld [vmem:[#allocation5 + $0x320] sm:$0xff] }
  0xab   : > { %709 = vmatprep.subr.mxu0 %v427_v4  ;;  %v2157_v4 = vmov 0.0  }
  0xac   : > { %710 = vmatpush1.msra.mxu0 %v426_v5  ;;  %1841 = vmatprep.subr.mxu1 %v2157_v4  ;;  %v532_v5 = vlaneseq }
  0xad   : > { %711 = vmatprep.subr.mxu0 %v421_v6  ;;  %1843 = vmatprep.mubr.msk.f32.mxu1 %vm2158_vm0, %v2157_v4 }
  0xae   : > { %712 = vmatpush1.msra.mxu0 %v420_v7  ;;  %v533_v6 = vshrl.u32 %v532_v5, 7 }
  0xaf   : > { %713 = vmatprep.subr.mxu0 %v415_v8  ;;  %v530_v8 = vld [vmem:[#allocation7] sm:$0x3f] }
  0xb0   : > { %714 = vmatpush1.msra.mxu0 %v414_v9  ;;  %v542_v7 = vsub.s32 2, %v533_v6  ;;  %v2365_v9 = vsub.s32 0, %v533_v6 }
  0xb1   : > { %715 = vmatprep.subr.mxu0 %v409_v10  ;;  %v546_v10 = vsub.s32 3, %v533_v6 }
  0xb2   : > { %716 = vmatpush1.msra.mxu0 %v408_v11  ;;  %v543_v11 = vrot.slane %v530_v8, %v542_v7 }
  0xb3   : > { %717 = vmatprep.subr.mxu0 %v403_v12  ;;  %v2367_v12 = vsub.s32 1, %v533_v6 }
  0xb4   : > { %718 = vmatpush1.msra.mxu0 %v402_v13  ;;  %v535_v13 = vrot.slane %v530_v8, %v2365_v9 }
  0xb5   : > { %719 = vmatprep.subr.mxu0 %v397_v14  ;;  %v547_v14 = vrot.slane %v530_v8, %v546_v10 }
  0xb6   : > { %720 = vmatpush1.msra.mxu0 %v396_v15 }
  0xb7   : > { %721 = vmatprep.subr.mxu0 %v391_v16 }
  0xb8   : > { %722 = vmatpush1.msra.mxu0 %v390_v17  ;;  %v539_v17 = vrot.slane %v530_v8, %v2367_v12 }
  0xb9   : > { %723 = vmatprep.subr.mxu0 %v385_v18 }
  0xba   : > { %724 = vmatpush1.msra.mxu0 %v384_v19 }
  0xbb   : > { %725 = vmatprep.subr.mxu0 %v379_v20 }
  0xbc   : > { %726 = vmatpush1.msra.mxu0 %v378_v21 }
  0xbd   : > { %727 = vmatprep.subr.mxu0 %v373_v22 }
  0xbe   : > { %728 = vmatpush1.msra.mxu0 %v372_v23 }
  0xbf   : > { %729 = vmatprep.subr.mxu0 %v367_v24  ;;  %v550_v24 = vsub.s32 4, %v533_v6 }
  0xc0   : > { %730 = vmatpush1.msra.mxu0 %v366_v25  ;;  %v554_v25 = vsub.s32 5, %v533_v6 }
  0xc1   : > { %731 = vmatprep.subr.mxu0 %v361_v26  ;;  %v551_v26 = vrot.slane %v530_v8, %v550_v24 }
  0xc2   : > { %732 = vmatpush1.msra.mxu0 %v360_v27 }
  0xc3   : > { %733 = vmatprep.subr.mxu0 %v355_v28  ;;  %v555_v28 = vrot.slane %v530_v8, %v554_v25 }
  0xc4   : > { %734 = vmatpush1.msra.mxu0 %v354_v29 }
  0xc5   : > { %735 = vmatprep.subr.mxu0 %v349_v30 }
  0xc6   : > { %736 = vmatpush1.msra.mxu0 %v348_v31 }
  0xc7   : > { %737 = vmatprep.subr.mxu0 %v343_v32 }
  0xc8   : > { %738 = vmatpush1.msra.mxu0 %v342_v33 }
  0xc9   : > { %739 = vmatprep.subr.mxu0 %v529_v34 }
  0xca   : > { %740 = vmatpush2.msra.mxu0 %v528_v35 }
  0xcb   : > { %741 = vmatprep.subr.mxu0 %v523_v36 }
  0xcc   : > { %742 = vmatpush2.msra.mxu0 %v522_v37 }
  0xcd   : > { %743 = vmatprep.subr.mxu0 %v517_v38 }
  0xce   : > { %744 = vmatpush2.msra.mxu0 %v516_v39 }
  0xcf   : > { %745 = vmatprep.subr.mxu0 %v511_v40 }
  0xd0   : > { %746 = vmatpush2.msra.mxu0 %v510_v41 }
  0xd1   : > { %747 = vmatprep.subr.mxu0 %v505_v42 }
  0xd2   : > { %748 = vmatpush2.msra.mxu0 %v504_v43 }
  0xd3   : > { %749 = vmatprep.subr.mxu0 %v499_v44 }
  0xd4   : > { %750 = vmatpush2.msra.mxu0 %v498_v45 }
  0xd5   : > { %751 = vmatprep.subr.mxu0 %v493_v46 }
  0xd6   : > { %752 = vmatpush2.msra.mxu0 %v492_v47 }
  0xd7   : > { %753 = vmatprep.subr.mxu0 %v487_v48 }
  0xd8   : > { %754 = vmatpush2.msra.mxu0 %v486_v49 }
  0xd9   : > { %755 = vmatprep.subr.mxu0 %v481_v50 }
  0xda   : > { %756 = vmatpush2.msra.mxu0 %v480_v51 }
  0xdb   : > { %757 = vmatprep.subr.mxu0 %v475_v52 }
  0xdc   : > { %758 = vmatpush2.msra.mxu0 %v474_v53 }
  0xdd   : > { %759 = vmatprep.subr.mxu0 %v469_v55 }
  0xde   : > { %760 = vmatpush2.msra.mxu0 %v468_v56 }
  0xdf   : > { %761 = vmatprep.subr.mxu0 %v463_v57 }
  0xe0   : > { %762 = vmatpush2.msra.mxu0 %v462_v58 }
  0xe1   : > { %763 = vmatprep.subr.mxu0 %v457_v59 }
  0xe2   : > { %764 = vmatpush2.msra.mxu0 %v456_v60 }
  0xe3   : > { %765 = vmatprep.subr.mxu0 %v451_v62 }
  0xe4   : > { %766 = vmatpush2.msra.mxu0 %v450_v63 }
  0xe5   : > { %767 = vmatprep.subr.mxu0 %v445_v0 }
  0xe6   : > { %768 = vmatpush2.msra.mxu0 %v444_v1 }
  0xe7   : > { %769 = vmatprep.subr.mxu0 %v439_v2 }
  0xe8   : > { %770 = vmatpush2.msra.mxu0 %v438_v3 }
  0xe9   : > { %772 = vmatmul.mubr.f32.vlgmr.msra.gmra.mxu0 %v2347_v54  ;;  %1821 = vmatprep.subr.mxu0 %v2157_v4 }
  0xea   : > { %1823 = vmatprep.mubr.msk.f32.mxu0 %vm2158_vm0, %v2157_v4 }
 0x167   : > { %v702_v15 = vpop.f32.mrf.mxu1 }
 0x168   : > { %v703_v16 = vadd.f32 %v702_v15, %v543_v11 }
 0x169   : > { %v631_v18 = vpop.f32.mrf.mxu0  ;;  %v704_v19 = vpop.f32.mrf.mxu1 }
 0x16a   : > { %v632_v20 = vadd.f32 %v631_v18, %v535_v13  ;;  %v705_v21 = vadd.f32 %v704_v19, %v547_v14  ;;  %947 = vrot.lane.b32.xlu1 %v703_v16, %s2159_s30  ;;  %1822 = vmatpush3.xpose.msk.msra.mxu0 %vm778_vm1, %v703_v16 }
 0x16b   : > { %v633_v22 = vpop.f32.mrf.mxu0  ;;  %1826 = vmatprep.subr.mxu0 %v2157_v4 }
 0x16c   : > { %v634_v23 = vadd.f32 %v633_v22, %v539_v17  ;;  %1842 = vmatpush3.xpose.msk.msra.mxu1 %vm778_vm1, %v705_v21 }
 0x16d   : > { %1824 = vmatmul.mubr.msk.f32.vlgmr.msra.gmra.mxu0 %vm778_vm1, %v632_v20  ;;  %1846 = vmatprep.subr.mxu1 %v2157_v4 }
 0x16e   : > { %1274 = vrot.lane.b32.xlu1 %v634_v23, %s2159_s30  ;;  %1828 = vmatprep.mubr.msk.f32.mxu0 %vm2158_vm0, %v2157_v4 }
 0x16f   : > { %1844 = vmatmul.mubr.msk.f32.vlgmr.msra.gmra.mxu1 %vm778_vm1, %v634_v23 }
 0x170   : > { %1848 = vmatprep.mubr.msk.f32.mxu1 %vm2158_vm0, %v2157_v4 }
 0x1a9   : > { %v773_v27 = vpop.f32.mrf.mxu0 }
 0x1aa   : > { %v2383_v30 = vadd.f32 %v773_v27, %v551_v26  ;;  %v1481_v26 = vld [vmem:[#allocation8 + $0xf8] sm:$0xff]  ;;  %v1480_v27 = vld [vmem:[#allocation8 + $0xf0] sm:$0xff] }
 0x1ab   : > { %v775_v29 = vpop.f32.mrf.mxu0 }
 0x1ac   : > { %v2385_v31 = vadd.f32 %v775_v29, %v555_v28  ;;  %1827 = vmatpush3.msk.msra.mxu0 %vm871_vm2, %v2383_v30  ;;  %v1479_v28 = vld [vmem:[#allocation8 + $0xe8] sm:$0xff]  ;;  %v1478_v29 = vld [vmem:[#allocation8 + $0xe0] sm:$0xff] }
 0x1ad   : > { %1831 = vmatprep.subr.mxu0 %v2157_v4 }
 0x1ae   : > { %1847 = vmatpush3.msk.msra.mxu1 %vm871_vm2, %v2385_v31 }
 0x1af   : > { %1851 = vmatprep.subr.mxu1 %v2157_v4 }
 0x1dc   : > { %v948_v48 = vpop.permute.xlu1 %947 }
 0x1e0   : > { %v1275_v49 = vpop.permute.xlu1 %1274 }
 0x22d   : > { %v851_v32 = vpop.f32.mrf.mxu0 }
 0x22e   : > { %v856_v37 = vsel %vm855_vm3, %v851_v32, -inf }
 0x22f   : > { %v1825_v33 = vpop.f32.mrf.mxu0  ;;  %v1183_v34 = vpop.f32.mrf.mxu1 }
 0x230   : > { %v1187_v35 = vsel %vm855_vm3, %v1183_v34, -inf  ;;  %v1474_v33 = vld [vmem:[#allocation8 + $0xc0] sm:$0xff] }
 0x231   : > { %1188 = vmax.xlane.f32.xlu0 %v1187_v35  ;;  %v1845_v36 = vpop.f32.mrf.mxu1  ;;  %v1472_v35 = vld [vmem:[#allocation8 + $0xb0] sm:$0xff] }
 0x232   : > { %v1471_v36 = vld [vmem:[#allocation8 + $0xa8] sm:$0xff] }
 0x235   : > { %857 = vmax.xlane.f32.xlu0 %v856_v37  ;;  %v1470_v37 = vld [vmem:[#allocation8 + $0xa0] sm:$0xff] }
 0x24b   : > { %1276 = vrot.lane.b32.xlu0 %v705_v21, %s2159_s30 }
 0x2ba   : > { %v1189_v38 = vpop.xlane.xlu0 %1188 }
 0x2bb   : > { %v1190_v39 = vsub.f32 %v1183_v34, %v1189_v38  ;;  %v1473_v34 = vld [vmem:[#allocation8 + $0xb8] sm:$0xff] }
 0x2bc   : > { %v1469_v38 = vld [vmem:[#allocation8 + $0x98] sm:$0xff] }
 0x2bd   : > { %v1191_v42 = vmul.f32 1.442695, %v1190_v39  ;;  %v1468_v39 = vld [vmem:[#allocation8 + $0x90] sm:$0xff] }
 0x2be   : > { %v858_v40 = vpop.xlane.xlu0 %857 }
 0x2bf   : > { %v859_v41 = vsub.f32 %v851_v32, %v858_v40  ;;  %v1475_v32 = vld [vmem:[#allocation8 + $0xc8] sm:$0xff] }
 0x2c0   : > { %v1467_v40 = vld [vmem:[#allocation8 + $0x88] sm:$0xff] }
 0x2c1   : > { %v860_v43 = vmul.f32 1.442695, %v859_v41  ;;  %v1466_v41 = vld [vmem:[#allocation8 + $0x80] sm:$0xff] }
 0x2c2   : > { %v1277_v58 = vpop.permute.xlu0 %1276 }
 0x2c3   : > { %1951 = vpow2.f32 %v860_v43  ;;  %v1464_v43 = vld [vmem:[#allocation8 + $0x70] sm:$0xff] }
 0x2c4   : > { %1953 = vpow2.f32 %v1191_v42  ;;  %v1465_v42 = vld [vmem:[#allocation8 + $0x78] sm:$0xff] }
 0x2d0   : > { %v1952_v44 = vpop.eup %1951 }
 0x2d1   : > { %v862_v45 = vsel %vm855_vm3, %v1952_v44, 0.0  ;;  %v1954_v46 = vpop.eup %1953 }
 0x2d2   : > { %863 = vadd.xlane.f32.xlu1 %v862_v45  ;;  %v1193_v47 = vsel %vm855_vm3, %v1954_v46, 0.0  ;;  %v1462_v45 = vld [vmem:[#allocation8 + $0x60] sm:$0xff] }
 0x2d6   : > { %1194 = vadd.xlane.f32.xlu1 %v1193_v47  ;;  %v1460_v47 = vld [vmem:[#allocation8 + $0x50] sm:$0xff] }
 0x2e7   : > { %945 = vrot.lane.b32.xlu1 %v632_v20, %s2159_s30 }
 0x35b   : > { %v864_v50 = vpop.xlane.xlu1 %863 }
 0x35c   : > { %1955 = vrcp.f32 %v864_v50  ;;  %v1457_v50 = vld [vmem:[#allocation8 + $0x38] sm:$0xff] }
 0x35f   : > { %v1195_v51 = vpop.xlane.xlu1 %1194 }
 0x360   : > { %1957 = vrcp.f32 %v1195_v51  ;;  %v1456_v51 = vld [vmem:[#allocation8 + $0x30] sm:$0xff] }
 0x363   : > { %v946_v57 = vpop.permute.xlu1 %945 }
 0x369   : > { %v1956_v52 = vpop.eup %1955 }
 0x36a   : > { %v866_v53 = vmul.f32 %v1956_v52, %v1952_v44  ;;  %v1463_v44 = vld [vmem:[#allocation8 + $0x68] sm:$0xff] }
 0x36b   : > { %v1455_v52 = vld [vmem:[#allocation8 + $0x28] sm:$0xff] }
 0x36c   : > { %1829 = vmatmul.mubr.msk.f32.vlgmr.msra.gmra.mxu0 %vm867_vm4, %v866_v53  ;;  %v1454_v53 = vld [vmem:[#allocation8 + $0x20] sm:$0xff] }
 0x36d   : > { %v1958_v55 = vpop.eup %1957  ;;  %1832 = vmatpush3.xpose.msk.msra.mxu0 %vm778_vm1, %v948_v48  ;;  %1833 = vmatprep.mubr.msk.f32.mxu0 %vm2158_vm0, %v2157_v4  ;;  %v1459_v48 = vld [vmem:[#allocation8 + $0x48] sm:$0xff] }
 0x36e   : > { %v1197_v56 = vmul.f32 %v1958_v55, %v1954_v46  ;;  %1836 = vmatprep.subr.mxu0 %v2157_v4  ;;  %v1461_v46 = vld [vmem:[#allocation8 + $0x58] sm:$0xff] }
 0x36f   : > { %v1453_v55 = vld [vmem:[#allocation8 + $0x18] sm:$0xff] }
 0x370   : > { %1834 = vmatmul.mubr.msk.f32.vlgmr.msra.gmra.mxu0 %vm778_vm1, %v946_v57  ;;  %1849 = vmatmul.mubr.msk.f32.vlgmr.msra.gmra.mxu1 %vm867_vm4, %v1197_v56  ;;  %v1452_v56 = vld [vmem:[#allocation8 + $0x10] sm:$0xff]  ;;  %v1451_v57 = vld [vmem:[#allocation8 + $0x8] sm:$0xff] }
 0x371   : > { %1852 = vmatpush3.xpose.msk.msra.mxu1 %vm778_vm1, %v1277_v58  ;;  %1853 = vmatprep.mubr.msk.f32.mxu1 %vm2158_vm0, %v2157_v4  ;;  %v1450_v58 = vld [vmem:[#allocation8] sm:$0xff] }
 0x372   : > { %1856 = vmatprep.subr.mxu1 %v2157_v4  ;;  %1838 = vmatprep.mubr.msk.f32.mxu0 %vm2158_vm0, %v2157_v4 }
 0x374   : > { %1854 = vmatmul.mubr.msk.f32.vlgmr.msra.gmra.mxu1 %vm778_vm1, %v1275_v49  ;;  %v1458_v49 = vld [vmem:[#allocation8 + $0x40] sm:$0xff] }
 0x375   : > { %1858 = vmatprep.mubr.msk.f32.mxu1 %vm2158_vm0, %v2157_v4 }
 0x42c   : > { %v2415_v59 = vpop.f32.mrf.mxu0 }
 0x42e   : > { %v1830_v60 = vpop.f32.mrf.mxu0 }
 0x42f   : > { %v1513_v60 = vld [vmem:[#allocation8 + $0x1f8] sm:$0xff] }
 0x430   : > { %v1019_v62 = vpop.f32.mrf.mxu0  ;;  %v2417_v63 = vpop.f32.mrf.mxu1 }
 0x431   : > { %v1023_v0 = vsel %vm855_vm3, %v1019_v62, -inf }
 0x432   : > { %v1850_v1 = vpop.f32.mrf.mxu1  ;;  %1024 = vmax.xlane.f32.xlu1 %v1023_v0  ;;  %v1835_v2 = vpop.f32.mrf.mxu0  ;;  %v1511_v0 = vld [vmem:[#allocation8 + $0x1e8] sm:$0xff] }
 0x433   : > { %v1510_v1 = vld [vmem:[#allocation8 + $0x1e0] sm:$0xff]  ;;  %v1509_v2 = vld [vmem:[#allocation8 + $0x1d8] sm:$0xff] }
 0x434   : > { %v1348_v3 = vpop.f32.mrf.mxu1 }
 0x435   : > { %v1352_v5 = vsel %vm855_vm3, %v1348_v3, -inf }
 0x436   : > { %1353 = vmax.xlane.f32.xlu0 %v1352_v5  ;;  %v1855_v6 = vpop.f32.mrf.mxu1  ;;  %v1507_v5 = vld [vmem:[#allocation8 + $0x1c8] sm:$0xff] }
 0x437   : > { %v1506_v6 = vld [vmem:[#allocation8 + $0x1c0] sm:$0xff] }
 0x443   : > { %1034 = vrot.lane.b32.xlu1 %v2383_v30, %s2159_s30  ;;  %v1477_v30 = vld [vmem:[#allocation8 + $0xd8] sm:$0xff] }
 0x4bb   : > { %v1025_v4 = vpop.xlane.xlu1 %1024 }
 0x4bc   : > { %v1026_v7 = vsub.f32 %v1019_v62, %v1025_v4  ;;  %v1512_v62 = vld [vmem:[#allocation8 + $0x1f0] sm:$0xff]  ;;  %v1505_v4 = vld [vmem:[#allocation8 + $0x1b8] sm:$0xff] }
 0x4be   : > { %v1027_v8 = vmul.f32 1.442695, %v1026_v7  ;;  %v1504_v7 = vld [vmem:[#allocation8 + $0x1b0] sm:$0xff] }
 0x4bf   : > { %v1354_v10 = vpop.xlane.xlu0 %1353  ;;  %v1035_v11 = vpop.permute.xlu1 %1034 }
 0x4c0   : > { %1959 = vpow2.f32 %v1027_v8  ;;  %v1355_v13 = vsub.f32 %v1348_v3, %v1354_v10  ;;  %1837 = vmatpush3.msk.msra.mxu0 %vm871_vm2, %v1035_v11  ;;  %v1508_v3 = vld [vmem:[#allocation8 + $0x1d0] sm:$0xff]  ;;  %v1503_v8 = vld [vmem:[#allocation8 + $0x1a8] sm:$0xff]  ;;  %v1502_v10 = vld [vmem:[#allocation8 + $0x1a0] sm:$0xff] }
 0x4c1   : > { %v1501_v11 = vld [vmem:[#allocation8 + $0x198] sm:$0xff] }
 0x4c2   : > { %v1356_v14 = vmul.f32 1.442695, %v1355_v13  ;;  %v1500_v13 = vld [vmem:[#allocation8 + $0x190] sm:$0xff] }
 0x4c4   : > { %1961 = vpow2.f32 %v1356_v14  ;;  %v1499_v14 = vld [vmem:[#allocation8 + $0x188] sm:$0xff] }
 0x4cd   : > { %v1960_v15 = vpop.eup %1959 }
 0x4ce   : > { %v1029_v16 = vsel %vm855_vm3, %v1960_v15, 0.0 }
 0x4cf   : > { %1030 = vadd.xlane.f32.xlu0 %v1029_v16  ;;  %v1497_v16 = vld [vmem:[#allocation8 + $0x178] sm:$0xff] }
 0x4d1   : > { %v1962_v17 = vpop.eup %1961 }
 0x4d2   : > { %v1358_v18 = vsel %vm855_vm3, %v1962_v17, 0.0 }
 0x4d3   : > { %1359 = vadd.xlane.f32.xlu0 %v1358_v18  ;;  %v1495_v18 = vld [vmem:[#allocation8 + $0x168] sm:$0xff] }
 0x4e9   : > { %1363 = vrot.lane.b32.xlu0 %v2385_v31, %s2159_s30  ;;  %v1476_v31 = vld [vmem:[#allocation8 + $0xd0] sm:$0xff] }
 0x558   : > { %v1031_v19 = vpop.xlane.xlu0 %1030 }
 0x559   : > { %1963 = vrcp.f32 %v1031_v19  ;;  %v1494_v19 = vld [vmem:[#allocation8 + $0x160] sm:$0xff] }
 0x55c   : > { %v1360_v20 = vpop.xlane.xlu0 %1359 }
 0x55d   : > { %1965 = vrcp.f32 %v1360_v20  ;;  %v1493_v20 = vld [vmem:[#allocation8 + $0x158] sm:$0xff] }
 0x560   : > { %v1364_v21 = vpop.permute.xlu0 %1363 }
 0x561   : > { %1857 = vmatpush3.msk.msra.mxu1 %vm871_vm2, %v1364_v21  ;;  %v1492_v21 = vld [vmem:[#allocation8 + $0x150] sm:$0xff] }
 0x562   : > { %1526 = vmatprep.subr.mxu1 %v1481_v26  ;;  %v1487_v26 = vld [vmem:[#allocation8 + $0x128] sm:$0xff] }
 0x566   : > { %v1964_v22 = vpop.eup %1963 }
 0x567   : > { %v1033_v23 = vmul.f32 %v1964_v22, %v1960_v15  ;;  %v1498_v15 = vld [vmem:[#allocation8 + $0x180] sm:$0xff]  ;;  %v1491_v22 = vld [vmem:[#allocation8 + $0x148] sm:$0xff] }
 0x569   : > { %1839 = vmatmul.mubr.msk.f32.vlgmr.msra.gmra.mxu0 %vm867_vm4, %v1033_v23  ;;  %v1490_v23 = vld [vmem:[#allocation8 + $0x140] sm:$0xff] }
 0x56a   : > { %v1966_v24 = vpop.eup %1965 }
 0x56b   : > { %v1362_v25 = vmul.f32 %v1966_v24, %v1962_v17  ;;  %v1496_v17 = vld [vmem:[#allocation8 + $0x170] sm:$0xff]  ;;  %v1489_v24 = vld [vmem:[#allocation8 + $0x138] sm:$0xff] }
 0x56d   : > { %1859 = vmatmul.mubr.msk.f32.vlgmr.msra.gmra.mxu1 %vm867_vm4, %v1362_v25  ;;  %v1488_v25 = vld [vmem:[#allocation8 + $0x130] sm:$0xff] }
 0x56e   : > { %1527 = vmatpush1.msra.mxu1 %v1480_v27  ;;  %v1486_v27 = vld [vmem:[#allocation8 + $0x120] sm:$0xff] }
 0x56f   : > { %1528 = vmatprep.subr.mxu1 %v1479_v28  ;;  %v1485_v28 = vld [vmem:[#allocation8 + $0x118] sm:$0xff] }
 0x570   : > { %1529 = vmatpush1.msra.mxu1 %v1478_v29  ;;  %v1484_v29 = vld [vmem:[#allocation8 + $0x110] sm:$0xff] }
 0x571   : > { %1530 = vmatprep.subr.mxu1 %v1477_v30  ;;  %v1483_v30 = vld [vmem:[#allocation8 + $0x108] sm:$0xff] }
 0x572   : > { %1531 = vmatpush1.msra.mxu1 %v1476_v31  ;;  %v1482_v31 = vld [vmem:[#allocation8 + $0x100] sm:$0xff] }
 0x573   : > { %1532 = vmatprep.subr.mxu1 %v1475_v32 }
 0x574   : > { %1533 = vmatpush1.msra.mxu1 %v1474_v33 }
 0x575   : > { %1534 = vmatprep.subr.mxu1 %v1473_v34 }
 0x576   : > { %1535 = vmatpush1.msra.mxu1 %v1472_v35 }
 0x577   : > { %1536 = vmatprep.subr.mxu1 %v1471_v36 }
 0x578   : > { %1537 = vmatpush1.msra.mxu1 %v1470_v37 }
 0x579   : > { %1538 = vmatprep.subr.mxu1 %v1469_v38 }
 0x57a   : > { %1539 = vmatpush1.msra.mxu1 %v1468_v39 }
 0x57b   : > { %1540 = vmatprep.subr.mxu1 %v1467_v40 }
 0x57c   : > { %1541 = vmatpush1.msra.mxu1 %v1466_v41 }
 0x57d   : > { %1542 = vmatprep.subr.mxu1 %v1465_v42  ;;  %v1514_v42 = vld [vmem:[%s2497_s4] sm:$0x3] }
 0x57e   : > { %1543 = vmatpush1.msra.mxu1 %v1464_v43  ;;  %v1519_v43 = vrot.slane %v1514_v42, %v2365_v9 }
 0x57f   : > { %1544 = vmatprep.subr.mxu1 %v1463_v44  ;;  %v1523_v44 = vrot.slane %v1514_v42, %v2367_v12 }
 0x580   : > { %1545 = vmatpush1.msra.mxu1 %v1462_v45 }
 0x581   : > { %1546 = vmatprep.subr.mxu1 %v1461_v46 }
 0x582   : > { %1547 = vmatpush1.msra.mxu1 %v1460_v47 }
 0x583   : > { %1548 = vmatprep.subr.mxu1 %v1459_v48 }
 0x584   : > { %1549 = vmatpush1.msra.mxu1 %v1458_v49 }
 0x585   : > { %1550 = vmatprep.subr.mxu1 %v1457_v50 }
 0x586   : > { %1551 = vmatpush1.msra.mxu1 %v1456_v51 }
 0x587   : > { %1552 = vmatprep.subr.mxu1 %v1455_v52 }
 0x588   : > { %1553 = vmatpush1.msra.mxu1 %v1454_v53 }
 0x589   : > { %1554 = vmatprep.subr.mxu1 %v1453_v55 }
 0x58a   : > { %1555 = vmatpush1.msra.mxu1 %v1452_v56 }
 0x58b   : > { %1556 = vmatprep.subr.mxu1 %v1451_v57 }
 0x58c   : > { %1557 = vmatpush1.msra.mxu1 %v1450_v58 }
 0x58d   : > { %1558 = vmatprep.subr.mxu1 %v1513_v60 }
 0x58e   : > { %1559 = vmatpush2.msra.mxu1 %v1512_v62 }
 0x58f   : > { %1560 = vmatprep.subr.mxu1 %v1511_v0 }
 0x590   : > { %1561 = vmatpush2.msra.mxu1 %v1510_v1 }
 0x591   : > { %1562 = vmatprep.subr.mxu1 %v1509_v2  ;;  %v1599_v2 = vld [vmem:[%s2498_s5] sm:$0x3] }
 0x592   : > { %1563 = vmatpush2.msra.mxu1 %v1508_v3  ;;  %v1600_v3 = vld [vmem:[%s2499_s6] sm:$0x3] }
 0x593   : > { %1564 = vmatprep.subr.mxu1 %v1507_v5  ;;  %v1626_v5 = vrot.slane %v1599_v2, %v2365_v9 }
 0x594   : > { %1565 = vmatpush2.msra.mxu1 %v1506_v6  ;;  %v1630_v6 = vrot.slane %v1599_v2, %v2367_v12 }
 0x595   : > { %1566 = vmatprep.subr.mxu1 %v1505_v4 }
 0x596   : > { %1567 = vmatpush2.msra.mxu1 %v1504_v7 }
 0x597   : > { %1568 = vmatprep.subr.mxu1 %v1503_v8 }
 0x598   : > { %1569 = vmatpush2.msra.mxu1 %v1502_v10  ;;  %v1639_v10 = vrot.slane %v1600_v3, %v2365_v9 }
 0x599   : > { %1570 = vmatprep.subr.mxu1 %v1501_v11  ;;  %v1643_v11 = vrot.slane %v1600_v3, %v2367_v12 }
 0x59a   : > { %1571 = vmatpush2.msra.mxu1 %v1500_v13 }
 0x59b   : > { %1572 = vmatprep.subr.mxu1 %v1499_v14 }
 0x59c   : > { %1573 = vmatpush2.msra.mxu1 %v1498_v15 }
 0x59d   : > { %1574 = vmatprep.subr.mxu1 %v1497_v16 }
 0x59e   : > { %1575 = vmatpush2.msra.mxu1 %v1496_v17 }
 0x59f   : > { %1576 = vmatprep.subr.mxu1 %v1495_v18 }
 0x5a0   : > { %1577 = vmatpush2.msra.mxu1 %v1494_v19 }
 0x5a1   : > { %1578 = vmatprep.subr.mxu1 %v1493_v20 }
 0x5a2   : > { %1579 = vmatpush2.msra.mxu1 %v1492_v21 }
 0x5a3   : > { %1580 = vmatprep.subr.mxu1 %v1491_v22 }
 0x5a4   : > { %1581 = vmatpush2.msra.mxu1 %v1490_v23 }
 0x5a5   : > { %1582 = vmatprep.subr.mxu1 %v1489_v24 }
 0x5a6   : > { %1583 = vmatpush2.msra.mxu1 %v1488_v25 }
 0x5a7   : > { %1584 = vmatprep.subr.mxu1 %v1487_v26 }
 0x5a8   : > { %1585 = vmatpush2.msra.mxu1 %v1486_v27 }
 0x5a9   : > { %1586 = vmatprep.subr.mxu1 %v1485_v28 }
 0x5aa   : > { %1587 = vmatpush2.msra.mxu1 %v1484_v29 }
 0x5ab   : > { %1588 = vmatprep.subr.mxu1 %v1483_v30 }
 0x5ac   : > { %1589 = vmatpush2.msra.mxu1 %v1482_v31 }
 0x629   : > { %v1107_v32 = vpop.f32.mrf.mxu0 }
 0x62b   : > { %v1840_v33 = vpop.f32.mrf.mxu0 }
 0x62d   : > { %v1436_v34 = vpop.f32.mrf.mxu1 }
 0x62e   : > { %v1945_v35 = vpack.i.bf16 %v1107_v32, %v1436_v34 }
 0x62f   : > { %v1860_v36 = vpop.f32.mrf.mxu1 }
 0x630   : > { %1946 = vrot.lane.b32.xlu1 %v1945_v35, %s2159_s30  ;;  %s2075_s30 = scalar_lea.vmem %s1669_s16, 128 }
 0x631   : > { %p2076_p4 = scmp.ne.s32.totalorder %s1669_s16, %s2075_s30  ;;  %p2083_p0 = scmp.lt.s32.totalorder %s2081_s19, %s2075_s30 }
 0x633   : > { %p2077_p11 = pnand %p2076_p4, %p2522_p6  ;;  %p2084_p7 = por %p2083_p0, %p2082_p3 }
 0x635   : > { %p2078_p13 = pneg %p2077_p11 }
 0x637   : > { %p2085_p9 = pnand %p2084_p7, %p2078_p13 }
 0x6a2   : > { %v1947_v37 = vpop.permute.xlu1 %1946 }
 0x6a3   : > { %v1949_v38 = vunpack.i.h.bf16 %v1947_v37  ;;  %v1948_v39 = vunpack.i.l.bf16 %v1947_v37 }
 0x6a5   : > { %v1449_v40 = vsel %vm778_vm1, %v2417_v63, %v1948_v39  ;;  %v1448_v41 = vsel %vm778_vm1, %v2415_v59, %v1949_v38 }
 0x6a6   : > { %1590 = vmatprep.mubr.f32.mxu1 %v1449_v40 }
 0x6a7   : > { %1591 = vmatmul.mubr.f32.vlgmr.msra.gmra.mxu1 %v1448_v41 }
 0x767   : > { %v1592_v45 = vpop.f32.mrf.mxu1 }
 0x768   : > { %v1593_v46 = vadd.f32 %v1592_v45, %v1519_v43 }
 0x769   : > { %v1594_v47 = vpop.f32.mrf.mxu1 }
 0x76a   : > { %v1597_v48 = vadd.f32 %v1593_v46, %v2347_v54  ;;  %v1595_v49 = vadd.f32 %v1594_v47, %v1523_v44 }
 0x76c   : > { %v1598_v63 = vadd.f32 %v1595_v49, %v2351_v61  ;;  %v1601_v59 = vsel %vm871_vm2, %v1597_v48, 0.0 }
 0x76e   : > { %v1602_v50 = vsel %vm871_vm2, %v1598_v63, 0.0 }
 0x76f   : > { %v1603_v51 = vadd.f32 %v1602_v50, %v1601_v59 }
 0x771   : > { %1604 = vadd.xlane.f32.xlu1 %v1603_v51 }
 0x7fa   : > { %v1605_v52 = vpop.xlane.xlu1 %1604 }
 0x7fb   : > { %v1607_v53 = vmul.f32 0.00390625, %v1605_v52 }
 0x7fd   : > { %v1608_v55 = vsub.f32 %v1597_v48, %v1607_v53  ;;  %v1609_v56 = vsub.f32 %v1598_v63, %v1607_v53 }
 0x7ff   : > { %v1610_v57 = vmul.f32 %v1608_v55, %v1608_v55  ;;  %v1611_v58 = vmul.f32 %v1609_v56, %v1609_v56 }
 0x801   : > { %v1612_v60 = vsel %vm871_vm2, %v1610_v57, 0.0  ;;  %v1613_v62 = vsel %vm871_vm2, %v1611_v58, 0.0 }
 0x802   : > { %v1614_v54 = vadd.f32 %v1613_v62, %v1612_v60 }
 0x804   : > { %1615 = vadd.xlane.f32.xlu0 %v1614_v54 }
 0x88d   : > { %v1616_v61 = vpop.xlane.xlu0 %1615 }
 0x88e   : > { %v1617_v0 = vmul.f32 0.00390625, %v1616_v61 }
 0x890   : > { %v1618_v1 = vadd.f32 1e-12, %v1617_v0 }
 0x892   : > { %1967 = vrsqrt.f32 %v1618_v1 }
 0x89f   : > { %v1968_v4 = vpop.eup %1967 }
 0x8a0   : > { %v1620_v7 = vmul.f32 %v1968_v4, %v1608_v55  ;;  %v1621_v8 = vmul.f32 %v1968_v4, %v1609_v56 }
 0x8a2   : > { %v1633_v13 = vmul.f32 %v1626_v5, %v1620_v7  ;;  %v1634_v14 = vmul.f32 %v1630_v6, %v1621_v8 }
 0x8a4   : > { %v1646_v15 = vadd.f32 %v1639_v10, %v1633_v13  ;;  %v1647_v16 = vadd.f32 %v1643_v11, %v1634_v14 }
 0x8a6   : > { %v1650_v17 = vcombine.low %v1646_v15, %v1647_v16 }
 0x8a8   : > { %1652 = vst [vmem:[%s336_s29] sm:$0xff] %v1650_v17 }
 0x8a9   : > { %2088 = shalt.err (!%p2085_p9)
}
 0x8aa   : > { %s2089_s10 = scalar_lea.hbm %s1666_s1, 128  ;;  %s2093_s14 = scalar_lea.hbm %s2500_s7, 2048 }
 0x8ab   : > { %p2090_p12 = scmp.ne.s32.totalorder %s1666_s1, %s2089_s10  ;;  %p2094_p10 = scmp.lt.s32.totalorder %s1666_s1, %s2500_s7 }
 0x8ac   : > { %p2095_p1 = scmp.lt.s32.totalorder %s2093_s14, %s2089_s10 }
 0x8ad   : > { %p2091_p8 = pnand %p2090_p12, %p2522_p6 }
 0x8ae   : > { %p2096_p2 = por %p2095_p1, %p2094_p10 }
 0x8af   : > { %p2092_p5 = pneg %p2091_p8 }
 0x8b1   : > { %p2097_p4 = pnand %p2096_p2, %p2092_p5 }
 0x8b3   : > { %2100 = shalt.err (!%p2097_p4)
}
 0x8b4   : > { %1875 = dma.vmem_to_hbm [thread:$0]  (%p2522_p6), %s1669_s16, 128, %s1666_s1, %s1654_s2  }
 0x8b5 PF: > { %p1902_p11 = scmp.ge.s32.totalorder %s2147_s27, 2  ;;  %s1680_s23 = sand.u32 1, %s2135_s24  }
 0x8b6   : > { %p2523_p13 = scmp.ne.s32.totalorder %s2508_s8, 0  ;;  %s1681_s29 = scalar_lea.sflag [#allocation4], %s1680_s23 }
 0x8b8   : > { %p1892_p3 = pnand %p1902_p11, %p2523_p13 }
 0x8ba   : > { %p1893_p0 = pneg %p1892_p3 }
 0x8bc   : > { %2130 = dma.done.wait (%p1893_p0), %s1681_s29, 128  }
 0x8bd   : > { %2132 = vsyncadd (%p1893_p0), %s1681_s29, 4294967168  ;;  %p22_p7 = scmp.ge.s32.totalorder %s2280_s17, 18   ;;  %s2524_s24 = smov %s2139_s25 }
 0x8be   : > { %s2525_s25 = smov %s2143_s26  ;;  %s2526_s26 = smov %s2290_s20 }
 0x8bf   : > { %s2527_s27 = smov %s2280_s17  ;;  %24 = sbr.rel (!%p22_p7) target bundleno = 10 (0xa), region = 105 }
 0x8c4   :  { %1686 = vsyncpa [#allocation3], 1 }
 0x8c5   :  { %1688 = vsyncpa [#allocation3 + $0x1], 1 }
 0x8c6   :  { %1689 = vsyncpa [#allocation6], 1 }
 0x8c7   :  { %1690 = vsyncpa [#allocation9], 1 }
 0x8c8   :  { %1691 = vsyncpa [#allocation4], 1 }
 0x8c9   :  { %1693 = vsyncpa [#allocation4 + $0x1], 1 }

</bundles_post_ra>
